<compile_context>
chip_gen: v6e
topology: v6e:2x2x1
jax: 0.10.0
libtpu: 0.0.40
codegen_flags: <defaults>
</compile_context>

<pallas_src>
import math
import functools

import jax
import jax.numpy as jnp
from jax.experimental import pallas as pl
from jax.experimental.pallas import tpu as pltpu


FUSED_PARAM_ORDER = (
    "sa_wqkv", "sa_bqkv", "sa_wo", "sa_bo",
    "ca_wq", "ca_bq", "ca_wkv", "ca_bkv", "ca_wo", "ca_bo",
    "ff_w1", "ff_b1", "ff_w2", "ff_b2",
    "ln_g", "ln_b",
)


# ----------------------------- in-kernel math ------------------------------
def _layer_norm(x2, gamma, beta, eps=1e-5):
    # PyTorch nn.LayerNorm: biased variance, eps=1e-5
    mu = jnp.mean(x2, axis=-1, keepdims=True)
    var = jnp.mean((x2 - mu) ** 2, axis=-1, keepdims=True)
    return (x2 - mu) * jax.lax.rsqrt(var + eps) * gamma + beta


def _linear(x2, w, b):
    # x2: [rows, Din] -> [rows, Dout]; one fat 2-D MXU matmul.
    return jnp.dot(x2, w, preferred_element_type=jnp.float32) + b


def _split_heads(x2, bb, L, H, dh, offset=0):
    """[BB*L, ...] with head-grouped lanes -> [BB*H, L, dh], n = b*H + h."""
    per_head = [
        x2[:, offset + h * dh: offset + (h + 1) * dh].reshape(bb, 1, L, dh)
        for h in range(H)
    ]
    return jnp.concatenate(per_head, axis=1).reshape(bb * H, L, dh)


def _merge_heads(o, bb, L, H):
    """[BB*H, L, dh] -> [BB*L, H*dh] with head-grouped lanes."""
    dh = o.shape[-1]
    o4 = o.reshape(bb, H, L, dh)
    return jnp.concatenate(
        [o4[:, h:h + 1].reshape(bb * L, dh) for h in range(H)], axis=-1)


def _attention(qh, kh, vh, mask_bh, scale, approx_recip):
    """Single batched attention over the merged (batch_block * head) axis.

    qh: [N, Lq, dh], kh/vh: [N, Lk, dh], mask_bh: [N, Lq, Lk] (1=keep, 0=mask).
    Returns (out [N, Lq, dh], attn weights [N, Lq, Lk]).
    """
    s = jnp.einsum('nqd,nkd->nqk', qh, kh,
                   preferred_element_type=jnp.float32) * scale
    s = jnp.where(mask_bh < 0.5, -1e9, s)
    m = jnp.max(s, axis=-1, keepdims=True)
    e = jnp.exp(s - m)
    denom = jnp.sum(e, axis=-1, keepdims=True)
    if approx_recip:
        p = e * pl.reciprocal(denom, approx=True)   # EUP slot, frees the VPU
    else:
        p = e / denom
    o = jnp.einsum('nqk,nkd->nqd', p, vh, preferred_element_type=jnp.float32)
    return o, p


def _decoder_body(x, enc, tmask, cmask, p, num_heads, approx_recip=False):
    """Decoder block on a batch block. x: [BB, Lq, D], enc: [BB, Ls, D]."""
    bb, Lq, D = x.shape
    Ls = enc.shape[1]
    H = num_heads
    dh = D // H
    scale = 1.0 / math.sqrt(dh)
    g, b = p["ln_g"], p["ln_b"]

    x2 = x.reshape(bb * Lq, D)        # fold batch rows into the sublane dim
    enc2 = enc.reshape(bb * Ls, D)

    # ---- self-attention (fused QKV projection: one [D, 3D] matmul) ----
    qkv = _linear(x2, p["sa_wqkv"], p["sa_bqkv"])            # [BB*Lq, 3D]
    qh = _split_heads(qkv, bb, Lq, H, dh, 0)
    kh = _split_heads(qkv, bb, Lq, H, dh, D)
    vh = _split_heads(qkv, bb, Lq, H, dh, 2 * D)
    tmask_bh = jnp.broadcast_to(
        tmask[:, None], (bb, H, Lq, Lq)).reshape(bb * H, Lq, Lq)
    o, sa_p = _attention(qh, kh, vh, tmask_bh, scale, approx_recip)
    sa_out = _linear(_merge_heads(o, bb, Lq, H), p["sa_wo"], p["sa_bo"])
    h1 = _layer_norm(sa_out + x2, g, b)

    # ---- cross-attention (fused KV projection of encoder output) ----
    q = _linear(h1, p["ca_wq"], p["ca_bq"])                  # [BB*Lq, D]
    kv = _linear(enc2, p["ca_wkv"], p["ca_bkv"])             # [BB*Ls, 2D]
    qh = _split_heads(q, bb, Lq, H, dh, 0)
    kh = _split_heads(kv, bb, Ls, H, dh, 0)
    vh = _split_heads(kv, bb, Ls, H, dh, D)
    cmask_bh = jnp.broadcast_to(
        cmask[:, None], (bb, H, Lq, Ls)).reshape(bb * H, Lq, Ls)
    o, ca_p = _attention(qh, kh, vh, cmask_bh, scale, approx_recip)
    ca_out = _linear(_merge_heads(o, bb, Lq, H), p["ca_wo"], p["ca_bo"])
    h2 = _layer_norm(ca_out + h1, g, b)

    # ---- feed forward: Linear -> ReLU -> Linear ----
    ff = jnp.maximum(_linear(h2, p["ff_w1"], p["ff_b1"]), 0.0)
    ff = _linear(ff, p["ff_w2"], p["ff_b2"])
    h3 = _layer_norm(ff + h2, g, b)

    return (h3.reshape(bb, Lq, D),
            sa_p.reshape(bb, H, Lq, Lq),
            ca_p.reshape(bb, H, Lq, Ls))


# --------------------------------- kernel ----------------------------------
def _decoder_kernel(num_heads, x_ref, enc_ref, tmask_ref, cmask_ref, *rest):
    nparams = len(FUSED_PARAM_ORDER)
    param_refs = rest[:nparams]
    out_ref, saw_ref, caw_ref = rest[nparams:]

    p = {name: ref[...] for name, ref in zip(FUSED_PARAM_ORDER, param_refs)}

    out, sa_w, ca_w = _decoder_body(
        x_ref[...], enc_ref[...], tmask_ref[...], cmask_ref[...],
        p, num_heads, approx_recip=True)

    out_ref[...] = out
    saw_ref[...] = sa_w
    caw_ref[...] = ca_w


def transformer_decoder_block(input_seq, encoder_output, cross_mask, tgt_mask,
                              params, num_heads, batch_block=None):
    B, Lq, D = input_seq.shape
    Ls = encoder_output.shape[1]
    H = num_heads

    if batch_block is None:
        batch_block = min(B, 8)        # fold several sequences per grid step
    assert B % batch_block == 0, "batch must divide evenly into batch blocks"
    BB = batch_block
    grid = (B // BB,)

    weight_args = [params[k] for k in FUSED_PARAM_ORDER]

    def _full_spec(arr):
        nd = arr.ndim
        return pl.BlockSpec(arr.shape, lambda i, _nd=nd: (0,) * _nd)

    in_specs = [
        pl.BlockSpec((BB, Lq, D), lambda i: (i, 0, 0)),    # input_seq
        pl.BlockSpec((BB, Ls, D), lambda i: (i, 0, 0)),    # encoder_output
        pl.BlockSpec((BB, Lq, Lq), lambda i: (i, 0, 0)),   # tgt_mask
        pl.BlockSpec((BB, Lq, Ls), lambda i: (i, 0, 0)),   # cross_mask
    ] + [_full_spec(w) for w in weight_args]

    out_shape = (
        jax.ShapeDtypeStruct((B, Lq, D), jnp.float32),      # output
        jax.ShapeDtypeStruct((B, H, Lq, Lq), jnp.float32),  # self-attn weights
        jax.ShapeDtypeStruct((B, H, Lq, Ls), jnp.float32),  # cross-attn weights
    )
    out_specs = (
        pl.BlockSpec((BB, Lq, D), lambda i: (i, 0, 0)),
        pl.BlockSpec((BB, H, Lq, Lq), lambda i: (i, 0, 0, 0)),
        pl.BlockSpec((BB, H, Lq, Ls), lambda i: (i, 0, 0, 0)),
    )

    return pl.pallas_call(
        functools.partial(_decoder_kernel, num_heads),
        grid=grid,
        in_specs=in_specs,
        out_specs=out_specs,
        out_shape=out_shape,
        compiler_params=pltpu.CompilerParams(
            dimension_semantics=("parallel",)),   # distinct output blocks/step
    )(input_seq, encoder_output, tgt_mask, cross_mask, *weight_args)


# ------------------------------ param init ---------------------------------
def init_params(key, embed_dim, ff_hidden):
    ks = jax.random.split(key, 12)
    scale = 0.05
    D, F = embed_dim, ff_hidden

    def w(k, shape):
        return (scale * jax.random.normal(k, shape)).astype(jnp.float32)

    return {
        # self-attention: fused [D, 3D] QKV projection
        "sa_wqkv": jnp.concatenate(
            [w(ks[0], (D, D)), w(ks[1], (D, D)), w(ks[2], (D, D))], axis=1),
        "sa_bqkv": jnp.zeros((1, 3 * D), jnp.float32),
        "sa_wo": w(ks[3], (D, D)), "sa_bo": jnp.zeros((1, D), jnp.float32),
        # cross-attention: separate Q, fused [D, 2D] KV projection
        "ca_wq": w(ks[4], (D, D)), "ca_bq": jnp.zeros((1, D), jnp.float32),
        "ca_wkv": jnp.concatenate(
            [w(ks[5], (D, D)), w(ks[6], (D, D))], axis=1),
        "ca_bkv": jnp.zeros((1, 2 * D), jnp.float32),
        "ca_wo": w(ks[7], (D, D)), "ca_bo": jnp.zeros((1, D), jnp.float32),
        # feed-forward
        "ff_w1": w(ks[8], (D, F)), "ff_b1": w(ks[9], (1, F)),
        "ff_w2": w(ks[10], (F, D)), "ff_b2": w(ks[11], (1, D)),
        # shared LayerNorm
        "ln_g": jnp.ones((1, D), jnp.float32),
        "ln_b": jnp.zeros((1, D), jnp.float32),
    }


# ---------------------------------- main ------------------------------------
if __name__ == "__main__":
    B, Lq, Ls, D, H, FF = 2, 8, 12, 32, 4, 64

    key = jax.random.PRNGKey(0)
    k_x, k_enc, k_p = jax.random.split(key, 3)

    input_seq = jax.random.normal(k_x, (B, Lq, D), dtype=jnp.float32)
    encoder_output = jax.random.normal(k_enc, (B, Ls, D), dtype=jnp.float32)

    # tgt_mask: causal mask; cross_mask: all-visible
    tgt_mask = jnp.broadcast_to(
        jnp.tril(jnp.ones((Lq, Lq), jnp.float32)), (B, Lq, Lq))
    cross_mask = jnp.ones((B, Lq, Ls), jnp.float32)

    params = init_params(k_p, D, FF)

    out, sa_w, ca_w = transformer_decoder_block(
        input_seq, encoder_output, cross_mask, tgt_mask, params, H)
    jax.block_until_ready((out, sa_w, ca_w))

    # pure-JAX reference (exact softmax divide) for sanity
    ref_out, ref_sa, ref_ca = _decoder_body(
        input_seq, encoder_output, tgt_mask, cross_mask, params, H,
        approx_recip=False)

    # tolerances loosened slightly because the kernel uses the EUP
    # approximate reciprocal in the softmax
    assert jnp.allclose(out, ref_out, atol=5e-3, rtol=5e-3)
    assert jnp.allclose(sa_w, ref_sa, atol=2e-3, rtol=2e-3)
    assert jnp.allclose(ca_w, ref_ca, atol=2e-3, rtol=2e-3)

    print("KERNEL_OK")
</pallas_src>

<mosaic_0001>
module attributes {stable_mosaic.version = 11 : i64} {
  func.func @_decoder_kernel(%arg0: i32, %arg1: memref<2x8x32xf32, #tpu.memory_space<vmem>>, %arg2: memref<2x12x32xf32, #tpu.memory_space<vmem>>, %arg3: memref<2x8x8xf32, #tpu.memory_space<vmem>>, %arg4: memref<2x8x12xf32, #tpu.memory_space<vmem>>, %arg5: memref<32x96xf32, #tpu.memory_space<vmem>>, %arg6: memref<1x96xf32, #tpu.memory_space<vmem>>, %arg7: memref<32x32xf32, #tpu.memory_space<vmem>>, %arg8: memref<1x32xf32, #tpu.memory_space<vmem>>, %arg9: memref<32x32xf32, #tpu.memory_space<vmem>>, %arg10: memref<1x32xf32, #tpu.memory_space<vmem>>, %arg11: memref<32x64xf32, #tpu.memory_space<vmem>>, %arg12: memref<1x64xf32, #tpu.memory_space<vmem>>, %arg13: memref<32x32xf32, #tpu.memory_space<vmem>>, %arg14: memref<1x32xf32, #tpu.memory_space<vmem>>, %arg15: memref<32x64xf32, #tpu.memory_space<vmem>>, %arg16: memref<1x64xf32, #tpu.memory_space<vmem>>, %arg17: memref<64x32xf32, #tpu.memory_space<vmem>>, %arg18: memref<1x32xf32, #tpu.memory_space<vmem>>, %arg19: memref<1x32xf32, #tpu.memory_space<vmem>>, %arg20: memref<1x32xf32, #tpu.memory_space<vmem>>, %arg21: memref<2x8x32xf32, #tpu.memory_space<vmem>>, %arg22: memref<2x4x8x8xf32, #tpu.memory_space<vmem>>, %arg23: memref<2x4x8x12xf32, #tpu.memory_space<vmem>>) attributes {dimension_semantics = [#tpu.dimension_semantics<parallel>], iteration_bounds = array<i64: 1>, scalar_prefetch = 0 : i64, scratch_operands = 0 : i64, tpu.core_type = #tpu.core_type<tc>, window_params = [{transform_indices = @transform_0, window_bounds = array<i64: 2, 8, 32>}, {transform_indices = @transform_1, window_bounds = array<i64: 2, 12, 32>}, {transform_indices = @transform_2, window_bounds = array<i64: 2, 8, 8>}, {transform_indices = @transform_3, window_bounds = array<i64: 2, 8, 12>}, {pipeline_mode = #tpu.pipeline_mode<synchronous>, transform_indices = @transform_4, window_bounds = array<i64: 32, 96>}, {pipeline_mode = #tpu.pipeline_mode<synchronous>, transform_indices = @transform_5, window_bounds = array<i64: 1, 96>}, {pipeline_mode = #tpu.pipeline_mode<synchronous>, transform_indices = @transform_6, window_bounds = array<i64: 32, 32>}, {pipeline_mode = #tpu.pipeline_mode<synchronous>, transform_indices = @transform_7, window_bounds = array<i64: 1, 32>}, {pipeline_mode = #tpu.pipeline_mode<synchronous>, transform_indices = @transform_8, window_bounds = array<i64: 32, 32>}, {pipeline_mode = #tpu.pipeline_mode<synchronous>, transform_indices = @transform_9, window_bounds = array<i64: 1, 32>}, {pipeline_mode = #tpu.pipeline_mode<synchronous>, transform_indices = @transform_10, window_bounds = array<i64: 32, 64>}, {pipeline_mode = #tpu.pipeline_mode<synchronous>, transform_indices = @transform_11, window_bounds = array<i64: 1, 64>}, {pipeline_mode = #tpu.pipeline_mode<synchronous>, transform_indices = @transform_12, window_bounds = array<i64: 32, 32>}, {pipeline_mode = #tpu.pipeline_mode<synchronous>, transform_indices = @transform_13, window_bounds = array<i64: 1, 32>}, {pipeline_mode = #tpu.pipeline_mode<synchronous>, transform_indices = @transform_14, window_bounds = array<i64: 32, 64>}, {pipeline_mode = #tpu.pipeline_mode<synchronous>, transform_indices = @transform_15, window_bounds = array<i64: 1, 64>}, {pipeline_mode = #tpu.pipeline_mode<synchronous>, transform_indices = @transform_16, window_bounds = array<i64: 64, 32>}, {pipeline_mode = #tpu.pipeline_mode<synchronous>, transform_indices = @transform_17, window_bounds = array<i64: 1, 32>}, {pipeline_mode = #tpu.pipeline_mode<synchronous>, transform_indices = @transform_18, window_bounds = array<i64: 1, 32>}, {pipeline_mode = #tpu.pipeline_mode<synchronous>, transform_indices = @transform_19, window_bounds = array<i64: 1, 32>}, {transform_indices = @transform_20, window_bounds = array<i64: 2, 8, 32>}, {transform_indices = @transform_21, window_bounds = array<i64: 2, 4, 8, 8>}, {transform_indices = @transform_22, window_bounds = array<i64: 2, 4, 8, 12>}]} {
    %c0 = arith.constant 0 : index
    %c0_0 = arith.constant 0 : index
    %0 = vector.load %arg5[%c0, %c0_0] : memref<32x96xf32, #tpu.memory_space<vmem>>, vector<32x96xf32>
    %c0_1 = arith.constant 0 : index
    %c0_2 = arith.constant 0 : index
    %1 = vector.load %arg6[%c0_1, %c0_2] : memref<1x96xf32, #tpu.memory_space<vmem>>, vector<1x96xf32>
    %c0_3 = arith.constant 0 : index
    %c0_4 = arith.constant 0 : index
    %2 = vector.load %arg7[%c0_3, %c0_4] : memref<32x32xf32, #tpu.memory_space<vmem>>, vector<32x32xf32>
    %c0_5 = arith.constant 0 : index
    %c0_6 = arith.constant 0 : index
    %3 = vector.load %arg8[%c0_5, %c0_6] : memref<1x32xf32, #tpu.memory_space<vmem>>, vector<1x32xf32>
    %c0_7 = arith.constant 0 : index
    %c0_8 = arith.constant 0 : index
    %4 = vector.load %arg9[%c0_7, %c0_8] : memref<32x32xf32, #tpu.memory_space<vmem>>, vector<32x32xf32>
    %c0_9 = arith.constant 0 : index
    %c0_10 = arith.constant 0 : index
    %5 = vector.load %arg10[%c0_9, %c0_10] : memref<1x32xf32, #tpu.memory_space<vmem>>, vector<1x32xf32>
    %c0_11 = arith.constant 0 : index
    %c0_12 = arith.constant 0 : index
    %6 = vector.load %arg11[%c0_11, %c0_12] : memref<32x64xf32, #tpu.memory_space<vmem>>, vector<32x64xf32>
    %c0_13 = arith.constant 0 : index
    %c0_14 = arith.constant 0 : index
    %7 = vector.load %arg12[%c0_13, %c0_14] : memref<1x64xf32, #tpu.memory_space<vmem>>, vector<1x64xf32>
    %c0_15 = arith.constant 0 : index
    %c0_16 = arith.constant 0 : index
    %8 = vector.load %arg13[%c0_15, %c0_16] : memref<32x32xf32, #tpu.memory_space<vmem>>, vector<32x32xf32>
    %c0_17 = arith.constant 0 : index
    %c0_18 = arith.constant 0 : index
    %9 = vector.load %arg14[%c0_17, %c0_18] : memref<1x32xf32, #tpu.memory_space<vmem>>, vector<1x32xf32>
    %c0_19 = arith.constant 0 : index
    %c0_20 = arith.constant 0 : index
    %10 = vector.load %arg15[%c0_19, %c0_20] : memref<32x64xf32, #tpu.memory_space<vmem>>, vector<32x64xf32>
    %c0_21 = arith.constant 0 : index
    %c0_22 = arith.constant 0 : index
    %11 = vector.load %arg16[%c0_21, %c0_22] : memref<1x64xf32, #tpu.memory_space<vmem>>, vector<1x64xf32>
    %c0_23 = arith.constant 0 : index
    %c0_24 = arith.constant 0 : index
    %12 = vector.load %arg17[%c0_23, %c0_24] : memref<64x32xf32, #tpu.memory_space<vmem>>, vector<64x32xf32>
    %c0_25 = arith.constant 0 : index
    %c0_26 = arith.constant 0 : index
    %13 = vector.load %arg18[%c0_25, %c0_26] : memref<1x32xf32, #tpu.memory_space<vmem>>, vector<1x32xf32>
    %c0_27 = arith.constant 0 : index
    %c0_28 = arith.constant 0 : index
    %14 = vector.load %arg19[%c0_27, %c0_28] : memref<1x32xf32, #tpu.memory_space<vmem>>, vector<1x32xf32>
    %c0_29 = arith.constant 0 : index
    %c0_30 = arith.constant 0 : index
    %15 = vector.load %arg20[%c0_29, %c0_30] : memref<1x32xf32, #tpu.memory_space<vmem>>, vector<1x32xf32>
    %c0_31 = arith.constant 0 : index
    %c0_32 = arith.constant 0 : index
    %c0_33 = arith.constant 0 : index
    %16 = vector.load %arg1[%c0_31, %c0_32, %c0_33] : memref<2x8x32xf32, #tpu.memory_space<vmem>>, vector<2x8x32xf32>
    %c0_34 = arith.constant 0 : index
    %c0_35 = arith.constant 0 : index
    %c0_36 = arith.constant 0 : index
    %17 = vector.load %arg2[%c0_34, %c0_35, %c0_36] : memref<2x12x32xf32, #tpu.memory_space<vmem>>, vector<2x12x32xf32>
    %c0_37 = arith.constant 0 : index
    %c0_38 = arith.constant 0 : index
    %c0_39 = arith.constant 0 : index
    %18 = vector.load %arg3[%c0_37, %c0_38, %c0_39] : memref<2x8x8xf32, #tpu.memory_space<vmem>>, vector<2x8x8xf32>
    %c0_40 = arith.constant 0 : index
    %c0_41 = arith.constant 0 : index
    %c0_42 = arith.constant 0 : index
    %19 = vector.load %arg4[%c0_40, %c0_41, %c0_42] : memref<2x8x12xf32, #tpu.memory_space<vmem>>, vector<2x8x12xf32>
    %20 = vector.shape_cast %16 : vector<2x8x32xf32> to vector<16x32xf32>
    %21 = vector.shape_cast %17 : vector<2x12x32xf32> to vector<24x32xf32>
    %cst = arith.constant dense<0.000000e+00> : vector<16x96xf32>
    %22 = tpu.matmul %20, %0, %cst {dimension_numbers = #tpu.dot_dimension_numbers<[1], [0], [0], [1], [0, 0, 1, 1], [], []>} : vector<16x32xf32>, vector<32x96xf32>, vector<16x96xf32> -> vector<16x96xf32>
    %23 = vector.broadcast %1 : vector<1x96xf32> to vector<16x96xf32>
    %24 = arith.addf %22, %23 : vector<16x96xf32>
    %25 = vector.extract_strided_slice %24 {offsets = [0, 0], sizes = [16, 8], strides = [1, 1]} : vector<16x96xf32> to vector<16x8xf32>
    %26 = vector.shape_cast %25 : vector<16x8xf32> to vector<2x1x8x8xf32>
    %27 = vector.extract_strided_slice %24 {offsets = [0, 8], sizes = [16, 8], strides = [1, 1]} : vector<16x96xf32> to vector<16x8xf32>
    %28 = vector.shape_cast %27 : vector<16x8xf32> to vector<2x1x8x8xf32>
    %29 = vector.extract_strided_slice %24 {offsets = [0, 16], sizes = [16, 8], strides = [1, 1]} : vector<16x96xf32> to vector<16x8xf32>
    %30 = vector.shape_cast %29 : vector<16x8xf32> to vector<2x1x8x8xf32>
    %31 = vector.extract_strided_slice %24 {offsets = [0, 24], sizes = [16, 8], strides = [1, 1]} : vector<16x96xf32> to vector<16x8xf32>
    %32 = vector.shape_cast %31 : vector<16x8xf32> to vector<2x1x8x8xf32>
    %33 = tpu.concatenate %26, %28, %30, %32 in 1 : vector<2x1x8x8xf32>, vector<2x1x8x8xf32>, vector<2x1x8x8xf32>, vector<2x1x8x8xf32> -> vector<2x4x8x8xf32>
    %34 = vector.shape_cast %33 : vector<2x4x8x8xf32> to vector<8x8x8xf32>
    %35 = vector.extract_strided_slice %24 {offsets = [0, 32], sizes = [16, 8], strides = [1, 1]} : vector<16x96xf32> to vector<16x8xf32>
    %36 = vector.shape_cast %35 : vector<16x8xf32> to vector<2x1x8x8xf32>
    %37 = vector.extract_strided_slice %24 {offsets = [0, 40], sizes = [16, 8], strides = [1, 1]} : vector<16x96xf32> to vector<16x8xf32>
    %38 = vector.shape_cast %37 : vector<16x8xf32> to vector<2x1x8x8xf32>
    %39 = vector.extract_strided_slice %24 {offsets = [0, 48], sizes = [16, 8], strides = [1, 1]} : vector<16x96xf32> to vector<16x8xf32>
    %40 = vector.shape_cast %39 : vector<16x8xf32> to vector<2x1x8x8xf32>
    %41 = vector.extract_strided_slice %24 {offsets = [0, 56], sizes = [16, 8], strides = [1, 1]} : vector<16x96xf32> to vector<16x8xf32>
    %42 = vector.shape_cast %41 : vector<16x8xf32> to vector<2x1x8x8xf32>
    %43 = tpu.concatenate %36, %38, %40, %42 in 1 : vector<2x1x8x8xf32>, vector<2x1x8x8xf32>, vector<2x1x8x8xf32>, vector<2x1x8x8xf32> -> vector<2x4x8x8xf32>
    %44 = vector.shape_cast %43 : vector<2x4x8x8xf32> to vector<8x8x8xf32>
    %45 = vector.extract_strided_slice %24 {offsets = [0, 64], sizes = [16, 8], strides = [1, 1]} : vector<16x96xf32> to vector<16x8xf32>
    %46 = vector.shape_cast %45 : vector<16x8xf32> to vector<2x1x8x8xf32>
    %47 = vector.extract_strided_slice %24 {offsets = [0, 72], sizes = [16, 8], strides = [1, 1]} : vector<16x96xf32> to vector<16x8xf32>
    %48 = vector.shape_cast %47 : vector<16x8xf32> to vector<2x1x8x8xf32>
    %49 = vector.extract_strided_slice %24 {offsets = [0, 80], sizes = [16, 8], strides = [1, 1]} : vector<16x96xf32> to vector<16x8xf32>
    %50 = vector.shape_cast %49 : vector<16x8xf32> to vector<2x1x8x8xf32>
    %51 = vector.extract_strided_slice %24 {offsets = [0, 88], sizes = [16, 8], strides = [1, 1]} : vector<16x96xf32> to vector<16x8xf32>
    %52 = vector.shape_cast %51 : vector<16x8xf32> to vector<2x1x8x8xf32>
    %53 = tpu.concatenate %46, %48, %50, %52 in 1 : vector<2x1x8x8xf32>, vector<2x1x8x8xf32>, vector<2x1x8x8xf32>, vector<2x1x8x8xf32> -> vector<2x4x8x8xf32>
    %54 = vector.shape_cast %53 : vector<2x4x8x8xf32> to vector<8x8x8xf32>
    %55 = vector.shape_cast %18 : vector<2x8x8xf32> to vector<2x1x8x8xf32>
    %56 = vector.shape_cast %55 : vector<2x1x8x8xf32> to vector<2x1x8x8xf32>
    %57 = vector.broadcast %56 : vector<2x1x8x8xf32> to vector<2x4x8x8xf32>
    %58 = vector.shape_cast %57 : vector<2x4x8x8xf32> to vector<8x8x8xf32>
    "tpu.trace_start"() <{level = 10 : i32, message = "nqd,nkd->nqk"}> : () -> ()
    %cst_43 = arith.constant dense<0.000000e+00> : vector<8x8x8xf32>
    %59 = tpu.matmul %34, %44, %cst_43 {dimension_numbers = #tpu.dot_dimension_numbers<[2], [2], [1], [1], [0, 0, 0, 1, 1, 1], [0], [0]>} : vector<8x8x8xf32>, vector<8x8x8xf32>, vector<8x8x8xf32> -> vector<8x8x8xf32>
    "tpu.trace_stop"() : () -> ()
    %cst_44 = arith.constant 0.353553385 : f32
    %60 = vector.broadcast %cst_44 : f32 to vector<8x8x8xf32>
    %61 = arith.mulf %59, %60 : vector<8x8x8xf32>
    %cst_45 = arith.constant 5.000000e-01 : f32
    %62 = vector.broadcast %cst_45 : f32 to vector<8x8x8xf32>
    %63 = arith.cmpf olt, %58, %62 : vector<8x8x8xf32>
    %cst_46 = arith.constant -1.000000e+09 : f32
    %64 = vector.broadcast %cst_46 : f32 to vector<8x8x8xf32>
    %65 = arith.select %63, %64, %61 : vector<8x8x8xi1>, vector<8x8x8xf32>
    %cst_47 = arith.constant dense<0xFF800000> : vector<8x8xf32>
    %66 = vector.multi_reduction <maximumf>, %65, %cst_47 [2] : vector<8x8x8xf32> to vector<8x8xf32>
    %67 = vector.shape_cast %66 : vector<8x8xf32> to vector<8x8x1xf32>
    %68 = vector.broadcast %67 : vector<8x8x1xf32> to vector<8x8x8xf32>
    %69 = arith.subf %65, %68 : vector<8x8x8xf32>
    %70 = math.exp %69 : vector<8x8x8xf32>
    %cst_48 = arith.constant dense<0.000000e+00> : vector<8x8xf32>
    %71 = vector.multi_reduction <add>, %70, %cst_48 [2] : vector<8x8x8xf32> to vector<8x8xf32>
    %72 = vector.shape_cast %71 : vector<8x8xf32> to vector<8x8x1xf32>
    %73 = tpu.reciprocal %72 {approx = true} : vector<8x8x1xf32> -> vector<8x8x1xf32>
    %74 = vector.broadcast %73 : vector<8x8x1xf32> to vector<8x8x8xf32>
    %75 = arith.mulf %70, %74 : vector<8x8x8xf32>
    "tpu.trace_start"() <{level = 10 : i32, message = "nqk,nkd->nqd"}> : () -> ()
    %cst_49 = arith.constant dense<0.000000e+00> : vector<8x8x8xf32>
    %76 = tpu.matmul %75, %54, %cst_49 {dimension_numbers = #tpu.dot_dimension_numbers<[2], [1], [1], [2], [0, 0, 0, 1, 1, 2], [0], [0]>} : vector<8x8x8xf32>, vector<8x8x8xf32>, vector<8x8x8xf32> -> vector<8x8x8xf32>
    "tpu.trace_stop"() : () -> ()
    %77 = vector.shape_cast %76 : vector<8x8x8xf32> to vector<2x4x8x8xf32>
    %78 = vector.extract_strided_slice %77 {offsets = [0, 0, 0, 0], sizes = [2, 1, 8, 8], strides = [1, 1, 1, 1]} : vector<2x4x8x8xf32> to vector<2x1x8x8xf32>
    %79 = vector.shape_cast %78 : vector<2x1x8x8xf32> to vector<16x8xf32>
    %80 = vector.extract_strided_slice %77 {offsets = [0, 1, 0, 0], sizes = [2, 1, 8, 8], strides = [1, 1, 1, 1]} : vector<2x4x8x8xf32> to vector<2x1x8x8xf32>
    %81 = vector.shape_cast %80 : vector<2x1x8x8xf32> to vector<16x8xf32>
    %82 = vector.extract_strided_slice %77 {offsets = [0, 2, 0, 0], sizes = [2, 1, 8, 8], strides = [1, 1, 1, 1]} : vector<2x4x8x8xf32> to vector<2x1x8x8xf32>
    %83 = vector.shape_cast %82 : vector<2x1x8x8xf32> to vector<16x8xf32>
    %84 = vector.extract_strided_slice %77 {offsets = [0, 3, 0, 0], sizes = [2, 1, 8, 8], strides = [1, 1, 1, 1]} : vector<2x4x8x8xf32> to vector<2x1x8x8xf32>
    %85 = vector.shape_cast %84 : vector<2x1x8x8xf32> to vector<16x8xf32>
    %86 = tpu.concatenate %79, %81, %83, %85 in 1 : vector<16x8xf32>, vector<16x8xf32>, vector<16x8xf32>, vector<16x8xf32> -> vector<16x32xf32>
    %cst_50 = arith.constant dense<0.000000e+00> : vector<16x32xf32>
    %87 = tpu.matmul %86, %2, %cst_50 {dimension_numbers = #tpu.dot_dimension_numbers<[1], [0], [0], [1], [0, 0, 1, 1], [], []>} : vector<16x32xf32>, vector<32x32xf32>, vector<16x32xf32> -> vector<16x32xf32>
    %88 = vector.broadcast %3 : vector<1x32xf32> to vector<16x32xf32>
    %89 = arith.addf %87, %88 : vector<16x32xf32>
    %90 = arith.addf %89, %20 : vector<16x32xf32>
    %cst_51 = arith.constant dense<0.000000e+00> : vector<16xf32>
    %91 = vector.multi_reduction <add>, %90, %cst_51 [1] : vector<16x32xf32> to vector<16xf32>
    %92 = vector.shape_cast %91 : vector<16xf32> to vector<16x1xf32>
    %cst_52 = arith.constant 3.200000e+01 : f32
    %93 = vector.broadcast %cst_52 : f32 to vector<16x1xf32>
    %94 = arith.divf %92, %93 : vector<16x1xf32>
    %95 = vector.broadcast %94 : vector<16x1xf32> to vector<16x32xf32>
    %96 = arith.subf %90, %95 : vector<16x32xf32>
    %97 = arith.mulf %96, %96 : vector<16x32xf32>
    %cst_53 = arith.constant dense<0.000000e+00> : vector<16xf32>
    %98 = vector.multi_reduction <add>, %97, %cst_53 [1] : vector<16x32xf32> to vector<16xf32>
    %99 = vector.shape_cast %98 : vector<16xf32> to vector<16x1xf32>
    %cst_54 = arith.constant 3.200000e+01 : f32
    %100 = vector.broadcast %cst_54 : f32 to vector<16x1xf32>
    %101 = arith.divf %99, %100 : vector<16x1xf32>
    %102 = vector.broadcast %94 : vector<16x1xf32> to vector<16x32xf32>
    %103 = arith.subf %90, %102 : vector<16x32xf32>
    %cst_55 = arith.constant 9.99999974E-6 : f32
    %104 = vector.broadcast %cst_55 : f32 to vector<16x1xf32>
    %105 = arith.addf %101, %104 : vector<16x1xf32>
    %106 = math.rsqrt %105 : vector<16x1xf32>
    %107 = vector.broadcast %106 : vector<16x1xf32> to vector<16x32xf32>
    %108 = arith.mulf %103, %107 : vector<16x32xf32>
    %109 = vector.broadcast %14 : vector<1x32xf32> to vector<16x32xf32>
    %110 = arith.mulf %108, %109 : vector<16x32xf32>
    %111 = vector.broadcast %15 : vector<1x32xf32> to vector<16x32xf32>
    %112 = arith.addf %110, %111 : vector<16x32xf32>
    %cst_56 = arith.constant dense<0.000000e+00> : vector<16x32xf32>
    %113 = tpu.matmul %112, %4, %cst_56 {dimension_numbers = #tpu.dot_dimension_numbers<[1], [0], [0], [1], [0, 0, 1, 1], [], []>} : vector<16x32xf32>, vector<32x32xf32>, vector<16x32xf32> -> vector<16x32xf32>
    %114 = vector.broadcast %5 : vector<1x32xf32> to vector<16x32xf32>
    %115 = arith.addf %113, %114 : vector<16x32xf32>
    %cst_57 = arith.constant dense<0.000000e+00> : vector<24x64xf32>
    %116 = tpu.matmul %21, %6, %cst_57 {dimension_numbers = #tpu.dot_dimension_numbers<[1], [0], [0], [1], [0, 0, 1, 1], [], []>} : vector<24x32xf32>, vector<32x64xf32>, vector<24x64xf32> -> vector<24x64xf32>
    %117 = vector.broadcast %7 : vector<1x64xf32> to vector<24x64xf32>
    %118 = arith.addf %116, %117 : vector<24x64xf32>
    %119 = vector.extract_strided_slice %115 {offsets = [0, 0], sizes = [16, 8], strides = [1, 1]} : vector<16x32xf32> to vector<16x8xf32>
    %120 = vector.shape_cast %119 : vector<16x8xf32> to vector<2x1x8x8xf32>
    %121 = vector.extract_strided_slice %115 {offsets = [0, 8], sizes = [16, 8], strides = [1, 1]} : vector<16x32xf32> to vector<16x8xf32>
    %122 = vector.shape_cast %121 : vector<16x8xf32> to vector<2x1x8x8xf32>
    %123 = vector.extract_strided_slice %115 {offsets = [0, 16], sizes = [16, 8], strides = [1, 1]} : vector<16x32xf32> to vector<16x8xf32>
    %124 = vector.shape_cast %123 : vector<16x8xf32> to vector<2x1x8x8xf32>
    %125 = vector.extract_strided_slice %115 {offsets = [0, 24], sizes = [16, 8], strides = [1, 1]} : vector<16x32xf32> to vector<16x8xf32>
    %126 = vector.shape_cast %125 : vector<16x8xf32> to vector<2x1x8x8xf32>
    %127 = tpu.concatenate %120, %122, %124, %126 in 1 : vector<2x1x8x8xf32>, vector<2x1x8x8xf32>, vector<2x1x8x8xf32>, vector<2x1x8x8xf32> -> vector<2x4x8x8xf32>
    %128 = vector.shape_cast %127 : vector<2x4x8x8xf32> to vector<8x8x8xf32>
    %129 = vector.extract_strided_slice %118 {offsets = [0, 0], sizes = [24, 8], strides = [1, 1]} : vector<24x64xf32> to vector<24x8xf32>
    %130 = vector.shape_cast %129 : vector<24x8xf32> to vector<2x1x12x8xf32>
    %131 = vector.extract_strided_slice %118 {offsets = [0, 8], sizes = [24, 8], strides = [1, 1]} : vector<24x64xf32> to vector<24x8xf32>
    %132 = vector.shape_cast %131 : vector<24x8xf32> to vector<2x1x12x8xf32>
    %133 = vector.extract_strided_slice %118 {offsets = [0, 16], sizes = [24, 8], strides = [1, 1]} : vector<24x64xf32> to vector<24x8xf32>
    %134 = vector.shape_cast %133 : vector<24x8xf32> to vector<2x1x12x8xf32>
    %135 = vector.extract_strided_slice %118 {offsets = [0, 24], sizes = [24, 8], strides = [1, 1]} : vector<24x64xf32> to vector<24x8xf32>
    %136 = vector.shape_cast %135 : vector<24x8xf32> to vector<2x1x12x8xf32>
    %137 = tpu.concatenate %130, %132, %134, %136 in 1 : vector<2x1x12x8xf32>, vector<2x1x12x8xf32>, vector<2x1x12x8xf32>, vector<2x1x12x8xf32> -> vector<2x4x12x8xf32>
    %138 = vector.shape_cast %137 : vector<2x4x12x8xf32> to vector<8x12x8xf32>
    %139 = vector.extract_strided_slice %118 {offsets = [0, 32], sizes = [24, 8], strides = [1, 1]} : vector<24x64xf32> to vector<24x8xf32>
    %140 = vector.shape_cast %139 : vector<24x8xf32> to vector<2x1x12x8xf32>
    %141 = vector.extract_strided_slice %118 {offsets = [0, 40], sizes = [24, 8], strides = [1, 1]} : vector<24x64xf32> to vector<24x8xf32>
    %142 = vector.shape_cast %141 : vector<24x8xf32> to vector<2x1x12x8xf32>
    %143 = vector.extract_strided_slice %118 {offsets = [0, 48], sizes = [24, 8], strides = [1, 1]} : vector<24x64xf32> to vector<24x8xf32>
    %144 = vector.shape_cast %143 : vector<24x8xf32> to vector<2x1x12x8xf32>
    %145 = vector.extract_strided_slice %118 {offsets = [0, 56], sizes = [24, 8], strides = [1, 1]} : vector<24x64xf32> to vector<24x8xf32>
    %146 = vector.shape_cast %145 : vector<24x8xf32> to vector<2x1x12x8xf32>
    %147 = tpu.concatenate %140, %142, %144, %146 in 1 : vector<2x1x12x8xf32>, vector<2x1x12x8xf32>, vector<2x1x12x8xf32>, vector<2x1x12x8xf32> -> vector<2x4x12x8xf32>
    %148 = vector.shape_cast %147 : vector<2x4x12x8xf32> to vector<8x12x8xf32>
    %149 = vector.shape_cast %19 : vector<2x8x12xf32> to vector<2x1x8x12xf32>
    %150 = vector.shape_cast %149 : vector<2x1x8x12xf32> to vector<2x1x8x12xf32>
    %151 = vector.broadcast %150 : vector<2x1x8x12xf32> to vector<2x4x8x12xf32>
    %152 = vector.shape_cast %151 : vector<2x4x8x12xf32> to vector<8x8x12xf32>
    "tpu.trace_start"() <{level = 10 : i32, message = "nqd,nkd->nqk"}> : () -> ()
    %cst_58 = arith.constant dense<0.000000e+00> : vector<8x8x12xf32>
    %153 = tpu.matmul %128, %138, %cst_58 {dimension_numbers = #tpu.dot_dimension_numbers<[2], [2], [1], [1], [0, 0, 0, 1, 1, 1], [0], [0]>} : vector<8x8x8xf32>, vector<8x12x8xf32>, vector<8x8x12xf32> -> vector<8x8x12xf32>
    "tpu.trace_stop"() : () -> ()
    %cst_59 = arith.constant 0.353553385 : f32
    %154 = vector.broadcast %cst_59 : f32 to vector<8x8x12xf32>
    %155 = arith.mulf %153, %154 : vector<8x8x12xf32>
    %cst_60 = arith.constant 5.000000e-01 : f32
    %156 = vector.broadcast %cst_60 : f32 to vector<8x8x12xf32>
    %157 = arith.cmpf olt, %152, %156 : vector<8x8x12xf32>
    %cst_61 = arith.constant -1.000000e+09 : f32
    %158 = vector.broadcast %cst_61 : f32 to vector<8x8x12xf32>
    %159 = arith.select %157, %158, %155 : vector<8x8x12xi1>, vector<8x8x12xf32>
    %cst_62 = arith.constant dense<0xFF800000> : vector<8x8xf32>
    %160 = vector.multi_reduction <maximumf>, %159, %cst_62 [2] : vector<8x8x12xf32> to vector<8x8xf32>
    %161 = vector.shape_cast %160 : vector<8x8xf32> to vector<8x8x1xf32>
    %162 = vector.broadcast %161 : vector<8x8x1xf32> to vector<8x8x12xf32>
    %163 = arith.subf %159, %162 : vector<8x8x12xf32>
    %164 = math.exp %163 : vector<8x8x12xf32>
    %cst_63 = arith.constant dense<0.000000e+00> : vector<8x8xf32>
    %165 = vector.multi_reduction <add>, %164, %cst_63 [2] : vector<8x8x12xf32> to vector<8x8xf32>
    %166 = vector.shape_cast %165 : vector<8x8xf32> to vector<8x8x1xf32>
    %167 = tpu.reciprocal %166 {approx = true} : vector<8x8x1xf32> -> vector<8x8x1xf32>
    %168 = vector.broadcast %167 : vector<8x8x1xf32> to vector<8x8x12xf32>
    %169 = arith.mulf %164, %168 : vector<8x8x12xf32>
    "tpu.trace_start"() <{level = 10 : i32, message = "nqk,nkd->nqd"}> : () -> ()
    %cst_64 = arith.constant dense<0.000000e+00> : vector<8x8x8xf32>
    %170 = tpu.matmul %169, %148, %cst_64 {dimension_numbers = #tpu.dot_dimension_numbers<[2], [1], [1], [2], [0, 0, 0, 1, 1, 2], [0], [0]>} : vector<8x8x12xf32>, vector<8x12x8xf32>, vector<8x8x8xf32> -> vector<8x8x8xf32>
    "tpu.trace_stop"() : () -> ()
    %171 = vector.shape_cast %170 : vector<8x8x8xf32> to vector<2x4x8x8xf32>
    %172 = vector.extract_strided_slice %171 {offsets = [0, 0, 0, 0], sizes = [2, 1, 8, 8], strides = [1, 1, 1, 1]} : vector<2x4x8x8xf32> to vector<2x1x8x8xf32>
    %173 = vector.shape_cast %172 : vector<2x1x8x8xf32> to vector<16x8xf32>
    %174 = vector.extract_strided_slice %171 {offsets = [0, 1, 0, 0], sizes = [2, 1, 8, 8], strides = [1, 1, 1, 1]} : vector<2x4x8x8xf32> to vector<2x1x8x8xf32>
    %175 = vector.shape_cast %174 : vector<2x1x8x8xf32> to vector<16x8xf32>
    %176 = vector.extract_strided_slice %171 {offsets = [0, 2, 0, 0], sizes = [2, 1, 8, 8], strides = [1, 1, 1, 1]} : vector<2x4x8x8xf32> to vector<2x1x8x8xf32>
    %177 = vector.shape_cast %176 : vector<2x1x8x8xf32> to vector<16x8xf32>
    %178 = vector.extract_strided_slice %171 {offsets = [0, 3, 0, 0], sizes = [2, 1, 8, 8], strides = [1, 1, 1, 1]} : vector<2x4x8x8xf32> to vector<2x1x8x8xf32>
    %179 = vector.shape_cast %178 : vector<2x1x8x8xf32> to vector<16x8xf32>
    %180 = tpu.concatenate %173, %175, %177, %179 in 1 : vector<16x8xf32>, vector<16x8xf32>, vector<16x8xf32>, vector<16x8xf32> -> vector<16x32xf32>
    %cst_65 = arith.constant dense<0.000000e+00> : vector<16x32xf32>
    %181 = tpu.matmul %180, %8, %cst_65 {dimension_numbers = #tpu.dot_dimension_numbers<[1], [0], [0], [1], [0, 0, 1, 1], [], []>} : vector<16x32xf32>, vector<32x32xf32>, vector<16x32xf32> -> vector<16x32xf32>
    %182 = vector.broadcast %9 : vector<1x32xf32> to vector<16x32xf32>
    %183 = arith.addf %181, %182 : vector<16x32xf32>
    %184 = arith.addf %183, %112 : vector<16x32xf32>
    %cst_66 = arith.constant dense<0.000000e+00> : vector<16xf32>
    %185 = vector.multi_reduction <add>, %184, %cst_66 [1] : vector<16x32xf32> to vector<16xf32>
    %186 = vector.shape_cast %185 : vector<16xf32> to vector<16x1xf32>
    %cst_67 = arith.constant 3.200000e+01 : f32
    %187 = vector.broadcast %cst_67 : f32 to vector<16x1xf32>
    %188 = arith.divf %186, %187 : vector<16x1xf32>
    %189 = vector.broadcast %188 : vector<16x1xf32> to vector<16x32xf32>
    %190 = arith.subf %184, %189 : vector<16x32xf32>
    %191 = arith.mulf %190, %190 : vector<16x32xf32>
    %cst_68 = arith.constant dense<0.000000e+00> : vector<16xf32>
    %192 = vector.multi_reduction <add>, %191, %cst_68 [1] : vector<16x32xf32> to vector<16xf32>
    %193 = vector.shape_cast %192 : vector<16xf32> to vector<16x1xf32>
    %cst_69 = arith.constant 3.200000e+01 : f32
    %194 = vector.broadcast %cst_69 : f32 to vector<16x1xf32>
    %195 = arith.divf %193, %194 : vector<16x1xf32>
    %196 = vector.broadcast %188 : vector<16x1xf32> to vector<16x32xf32>
    %197 = arith.subf %184, %196 : vector<16x32xf32>
    %cst_70 = arith.constant 9.99999974E-6 : f32
    %198 = vector.broadcast %cst_70 : f32 to vector<16x1xf32>
    %199 = arith.addf %195, %198 : vector<16x1xf32>
    %200 = math.rsqrt %199 : vector<16x1xf32>
    %201 = vector.broadcast %200 : vector<16x1xf32> to vector<16x32xf32>
    %202 = arith.mulf %197, %201 : vector<16x32xf32>
    %203 = vector.broadcast %14 : vector<1x32xf32> to vector<16x32xf32>
    %204 = arith.mulf %202, %203 : vector<16x32xf32>
    %205 = vector.broadcast %15 : vector<1x32xf32> to vector<16x32xf32>
    %206 = arith.addf %204, %205 : vector<16x32xf32>
    %cst_71 = arith.constant dense<0.000000e+00> : vector<16x64xf32>
    %207 = tpu.matmul %206, %10, %cst_71 {dimension_numbers = #tpu.dot_dimension_numbers<[1], [0], [0], [1], [0, 0, 1, 1], [], []>} : vector<16x32xf32>, vector<32x64xf32>, vector<16x64xf32> -> vector<16x64xf32>
    %208 = vector.broadcast %11 : vector<1x64xf32> to vector<16x64xf32>
    %209 = arith.addf %207, %208 : vector<16x64xf32>
    %cst_72 = arith.constant 0.000000e+00 : f32
    %210 = vector.broadcast %cst_72 : f32 to vector<16x64xf32>
    %211 = arith.maximumf %209, %210 : vector<16x64xf32>
    %cst_73 = arith.constant dense<0.000000e+00> : vector<16x32xf32>
    %212 = tpu.matmul %211, %12, %cst_73 {dimension_numbers = #tpu.dot_dimension_numbers<[1], [0], [0], [1], [0, 0, 1, 1], [], []>} : vector<16x64xf32>, vector<64x32xf32>, vector<16x32xf32> -> vector<16x32xf32>
    %213 = vector.broadcast %13 : vector<1x32xf32> to vector<16x32xf32>
    %214 = arith.addf %212, %213 : vector<16x32xf32>
    %215 = arith.addf %214, %206 : vector<16x32xf32>
    %cst_74 = arith.constant dense<0.000000e+00> : vector<16xf32>
    %216 = vector.multi_reduction <add>, %215, %cst_74 [1] : vector<16x32xf32> to vector<16xf32>
    %217 = vector.shape_cast %216 : vector<16xf32> to vector<16x1xf32>
    %cst_75 = arith.constant 3.200000e+01 : f32
    %218 = vector.broadcast %cst_75 : f32 to vector<16x1xf32>
    %219 = arith.divf %217, %218 : vector<16x1xf32>
    %220 = vector.broadcast %219 : vector<16x1xf32> to vector<16x32xf32>
    %221 = arith.subf %215, %220 : vector<16x32xf32>
    %222 = arith.mulf %221, %221 : vector<16x32xf32>
    %cst_76 = arith.constant dense<0.000000e+00> : vector<16xf32>
    %223 = vector.multi_reduction <add>, %222, %cst_76 [1] : vector<16x32xf32> to vector<16xf32>
    %224 = vector.shape_cast %223 : vector<16xf32> to vector<16x1xf32>
    %cst_77 = arith.constant 3.200000e+01 : f32
    %225 = vector.broadcast %cst_77 : f32 to vector<16x1xf32>
    %226 = arith.divf %224, %225 : vector<16x1xf32>
    %227 = vector.broadcast %219 : vector<16x1xf32> to vector<16x32xf32>
    %228 = arith.subf %215, %227 : vector<16x32xf32>
    %cst_78 = arith.constant 9.99999974E-6 : f32
    %229 = vector.broadcast %cst_78 : f32 to vector<16x1xf32>
    %230 = arith.addf %226, %229 : vector<16x1xf32>
    %231 = math.rsqrt %230 : vector<16x1xf32>
    %232 = vector.broadcast %231 : vector<16x1xf32> to vector<16x32xf32>
    %233 = arith.mulf %228, %232 : vector<16x32xf32>
    %234 = vector.broadcast %14 : vector<1x32xf32> to vector<16x32xf32>
    %235 = arith.mulf %233, %234 : vector<16x32xf32>
    %236 = vector.broadcast %15 : vector<1x32xf32> to vector<16x32xf32>
    %237 = arith.addf %235, %236 : vector<16x32xf32>
    %238 = vector.shape_cast %237 : vector<16x32xf32> to vector<2x8x32xf32>
    %239 = vector.shape_cast %75 : vector<8x8x8xf32> to vector<2x4x8x8xf32>
    %240 = vector.shape_cast %169 : vector<8x8x12xf32> to vector<2x4x8x12xf32>
    %c0_79 = arith.constant 0 : index
    %c0_80 = arith.constant 0 : index
    %c0_81 = arith.constant 0 : index
    %241 = vector.load %arg21[%c0_79, %c0_80, %c0_81] : memref<2x8x32xf32, #tpu.memory_space<vmem>>, vector<2x8x32xf32>
    tpu.vector_store %arg21[%c0_79, %c0_80, %c0_81], %238 {strides = array<i32>} : memref<2x8x32xf32, #tpu.memory_space<vmem>>, vector<2x8x32xf32>,
    %c0_82 = arith.constant 0 : index
    %c0_83 = arith.constant 0 : index
    %c0_84 = arith.constant 0 : index
    %c0_85 = arith.constant 0 : index
    %242 = vector.load %arg22[%c0_82, %c0_83, %c0_84, %c0_85] : memref<2x4x8x8xf32, #tpu.memory_space<vmem>>, vector<2x4x8x8xf32>
    tpu.vector_store %arg22[%c0_82, %c0_83, %c0_84, %c0_85], %239 {strides = array<i32>} : memref<2x4x8x8xf32, #tpu.memory_space<vmem>>, vector<2x4x8x8xf32>,
    %c0_86 = arith.constant 0 : index
    %c0_87 = arith.constant 0 : index
    %c0_88 = arith.constant 0 : index
    %c0_89 = arith.constant 0 : index
    %243 = vector.load %arg23[%c0_86, %c0_87, %c0_88, %c0_89] : memref<2x4x8x12xf32, #tpu.memory_space<vmem>>, vector<2x4x8x12xf32>
    tpu.vector_store %arg23[%c0_86, %c0_87, %c0_88, %c0_89], %240 {strides = array<i32>} : memref<2x4x8x12xf32, #tpu.memory_space<vmem>>, vector<2x4x8x12xf32>,
    return
  }
  func.func @transform_0(%arg0: i32) -> (i32, i32, i32) {
    %c0_i32 = arith.constant 0 : i32
    %c0_i32_0 = arith.constant 0 : i32
    %c0_i32_1 = arith.constant 0 : i32
    return %arg0, %c0_i32, %c0_i32_0 : i32, i32, i32
  }
  func.func @transform_1(%arg0: i32) -> (i32, i32, i32) {
    %c0_i32 = arith.constant 0 : i32
    %c0_i32_0 = arith.constant 0 : i32
    %c0_i32_1 = arith.constant 0 : i32
    return %arg0, %c0_i32, %c0_i32_0 : i32, i32, i32
  }
  func.func @transform_2(%arg0: i32) -> (i32, i32, i32) {
    %c0_i32 = arith.constant 0 : i32
    %c0_i32_0 = arith.constant 0 : i32
    %c0_i32_1 = arith.constant 0 : i32
    return %arg0, %c0_i32, %c0_i32_0 : i32, i32, i32
  }
  func.func @transform_3(%arg0: i32) -> (i32, i32, i32) {
    %c0_i32 = arith.constant 0 : i32
    %c0_i32_0 = arith.constant 0 : i32
    %c0_i32_1 = arith.constant 0 : i32
    return %arg0, %c0_i32, %c0_i32_0 : i32, i32, i32
  }
  func.func @transform_4(%arg0: i32) -> (i32, i32) {
    %c0_i32 = arith.constant 0 : i32
    %c0_i32_0 = arith.constant 0 : i32
    %c0_i32_1 = arith.constant 0 : i32
    return %c0_i32, %c0_i32_0 : i32, i32
  }
  func.func @transform_5(%arg0: i32) -> (i32, i32) {
    %c0_i32 = arith.constant 0 : i32
    %c0_i32_0 = arith.constant 0 : i32
    %c0_i32_1 = arith.constant 0 : i32
    return %c0_i32, %c0_i32_0 : i32, i32
  }
  func.func @transform_6(%arg0: i32) -> (i32, i32) {
    %c0_i32 = arith.constant 0 : i32
    %c0_i32_0 = arith.constant 0 : i32
    %c0_i32_1 = arith.constant 0 : i32
    return %c0_i32, %c0_i32_0 : i32, i32
  }
  func.func @transform_7(%arg0: i32) -> (i32, i32) {
    %c0_i32 = arith.constant 0 : i32
    %c0_i32_0 = arith.constant 0 : i32
    %c0_i32_1 = arith.constant 0 : i32
    return %c0_i32, %c0_i32_0 : i32, i32
  }
  func.func @transform_8(%arg0: i32) -> (i32, i32) {
    %c0_i32 = arith.constant 0 : i32
    %c0_i32_0 = arith.constant 0 : i32
    %c0_i32_1 = arith.constant 0 : i32
    return %c0_i32, %c0_i32_0 : i32, i32
  }
  func.func @transform_9(%arg0: i32) -> (i32, i32) {
    %c0_i32 = arith.constant 0 : i32
    %c0_i32_0 = arith.constant 0 : i32
    %c0_i32_1 = arith.constant 0 : i32
    return %c0_i32, %c0_i32_0 : i32, i32
  }
  func.func @transform_10(%arg0: i32) -> (i32, i32) {
    %c0_i32 = arith.constant 0 : i32
    %c0_i32_0 = arith.constant 0 : i32
    %c0_i32_1 = arith.constant 0 : i32
    return %c0_i32, %c0_i32_0 : i32, i32
  }
  func.func @transform_11(%arg0: i32) -> (i32, i32) {
    %c0_i32 = arith.constant 0 : i32
    %c0_i32_0 = arith.constant 0 : i32
    %c0_i32_1 = arith.constant 0 : i32
    return %c0_i32, %c0_i32_0 : i32, i32
  }
  func.func @transform_12(%arg0: i32) -> (i32, i32) {
    %c0_i32 = arith.constant 0 : i32
    %c0_i32_0 = arith.constant 0 : i32
    %c0_i32_1 = arith.constant 0 : i32
    return %c0_i32, %c0_i32_0 : i32, i32
  }
  func.func @transform_13(%arg0: i32) -> (i32, i32) {
    %c0_i32 = arith.constant 0 : i32
    %c0_i32_0 = arith.constant 0 : i32
    %c0_i32_1 = arith.constant 0 : i32
    return %c0_i32, %c0_i32_0 : i32, i32
  }
  func.func @transform_14(%arg0: i32) -> (i32, i32) {
    %c0_i32 = arith.constant 0 : i32
    %c0_i32_0 = arith.constant 0 : i32
    %c0_i32_1 = arith.constant 0 : i32
    return %c0_i32, %c0_i32_0 : i32, i32
  }
  func.func @transform_15(%arg0: i32) -> (i32, i32) {
    %c0_i32 = arith.constant 0 : i32
    %c0_i32_0 = arith.constant 0 : i32
    %c0_i32_1 = arith.constant 0 : i32
    return %c0_i32, %c0_i32_0 : i32, i32
  }
  func.func @transform_16(%arg0: i32) -> (i32, i32) {
    %c0_i32 = arith.constant 0 : i32
    %c0_i32_0 = arith.constant 0 : i32
    %c0_i32_1 = arith.constant 0 : i32
    return %c0_i32, %c0_i32_0 : i32, i32
  }
  func.func @transform_17(%arg0: i32) -> (i32, i32) {
    %c0_i32 = arith.constant 0 : i32
    %c0_i32_0 = arith.constant 0 : i32
    %c0_i32_1 = arith.constant 0 : i32
    return %c0_i32, %c0_i32_0 : i32, i32
  }
  func.func @transform_18(%arg0: i32) -> (i32, i32) {
    %c0_i32 = arith.constant 0 : i32
    %c0_i32_0 = arith.constant 0 : i32
    %c0_i32_1 = arith.constant 0 : i32
    return %c0_i32, %c0_i32_0 : i32, i32
  }
  func.func @transform_19(%arg0: i32) -> (i32, i32) {
    %c0_i32 = arith.constant 0 : i32
    %c0_i32_0 = arith.constant 0 : i32
    %c0_i32_1 = arith.constant 0 : i32
    return %c0_i32, %c0_i32_0 : i32, i32
  }
  func.func @transform_20(%arg0: i32) -> (i32, i32, i32) {
    %c0_i32 = arith.constant 0 : i32
    %c0_i32_0 = arith.constant 0 : i32
    %c0_i32_1 = arith.constant 0 : i32
    return %arg0, %c0_i32, %c0_i32_0 : i32, i32, i32
  }
  func.func @transform_21(%arg0: i32) -> (i32, i32, i32, i32) {
    %c0_i32 = arith.constant 0 : i32
    %c0_i32_0 = arith.constant 0 : i32
    %c0_i32_1 = arith.constant 0 : i32
    %c0_i32_2 = arith.constant 0 : i32
    return %arg0, %c0_i32, %c0_i32_0, %c0_i32_1 : i32, i32, i32, i32
  }
  func.func @transform_22(%arg0: i32) -> (i32, i32, i32, i32) {
    %c0_i32 = arith.constant 0 : i32
    %c0_i32_0 = arith.constant 0 : i32
    %c0_i32_1 = arith.constant 0 : i32
    %c0_i32_2 = arith.constant 0 : i32
    return %arg0, %c0_i32, %c0_i32_0, %c0_i32_1 : i32, i32, i32, i32
  }
}

</mosaic_0001>

<bundles_post_ra>
// kernel: tpu_custom_call.1
= control target key start
LH: loop header
LB: loop body
LE: loop exit
PB: predicated region body
PF: predicated region fallthrough
CT: control target
= control target key end

     0   :  { %s5428_s0 = inlined_call_operand.hbm [shape: f32[2,8,32], index: 0, kind: input, shape index: {}]   ;;  %s5429_s1 = inlined_call_operand.vmem [shape: f32[2,12,32], index: 1, kind: input, shape index: {}]   ;;  %s5430_s2 = inlined_call_operand.hbm [shape: f32[2,8,8], index: 2, kind: input, shape index: {}]   ;;  %s5431_s3 = inlined_call_operand.hbm [shape: f32[2,8,12], index: 3, kind: input, shape index: {}]   ;;  %s5432_s4 = inlined_call_operand.vmem [shape: f32[32,96], index: 4, kind: input, shape index: {}]   ;;  %s5433_s5 = inlined_call_operand.vmem [shape: f32[1,96], index: 5, kind: input, shape index: {}]   ;;  %s5434_s6 = inlined_call_operand.vmem [shape: f32[32,32], index: 6, kind: input, shape index: {}]   ;;  %s5435_s7 = inlined_call_operand.vmem [shape: f32[1,32], index: 7, kind: input, shape index: {}]   ;;  %s5436_s8 = inlined_call_operand.vmem [shape: f32[32,32], index: 8, kind: input, shape index: {}]   ;;  %s5437_s9 = inlined_call_operand.vmem [shape: f32[1,32], index: 9, kind: input, shape index: {}]   ;;  %s5438_s10 = inlined_call_operand.vmem [shape: f32[32,64], index: 10, kind: input, shape index: {}]   ;;  %s5439_s11 = inlined_call_operand.vmem [shape: f32[1,64], index: 11, kind: input, shape index: {}]   ;;  %s5440_s12 = inlined_call_operand.vmem [shape: f32[32,32], index: 12, kind: input, shape index: {}]   ;;  %s5441_s13 = inlined_call_operand.vmem [shape: f32[1,32], index: 13, kind: input, shape index: {}]   ;;  %s5442_s14 = inlined_call_operand.hbm [shape: f32[32,64], index: 14, kind: input, shape index: {}]   ;;  %s5443_s15 = inlined_call_operand.vmem [shape: f32[1,64], index: 15, kind: input, shape index: {}]   ;;  %s5444_s16 = inlined_call_operand.vmem [shape: f32[64,32], index: 16, kind: input, shape index: {}]   ;;  %s5445_s17 = inlined_call_operand.vmem [shape: f32[1,32], index: 17, kind: input, shape index: {}]   ;;  %s5446_s18 = inlined_call_operand.vmem [shape: f32[1,32], index: 18, kind: input, shape index: {}]   ;;  %s5447_s19 = inlined_call_operand.vmem [shape: f32[1,32], index: 19, kind: input, shape index: {}]   ;;  %s5448_s20 = inlined_call_operand.hbm [shape: f32[2,8,32], index: 20, kind: output, shape index: {0}]   ;;  %s5449_s21 = inlined_call_operand.hbm [shape: f32[2,4,8,8], index: 21, kind: output, shape index: {1}]   ;;  %s5450_s22 = inlined_call_operand.hbm [shape: f32[2,4,8,12], index: 22, kind: output, shape index: {2}]  }
   0x1   :  { %5454 = sst [smem:[#allocation19_spill]] %s5428_s0 }
   0x2   :  { %5455 = sst [smem:[#allocation20_spill]] %s5429_s1 }
   0x3   :  { %5456 = sst [smem:[#allocation21_spill]] %s5430_s2 }
   0x4   :  { %5457 = sst [smem:[#allocation22_spill]] %s5431_s3 }
   0x5   :  { %5458 = sst [smem:[#allocation23_spill]] %s5432_s4 }
   0x6   :  { %5459 = sst [smem:[#allocation24_spill]] %s5433_s5 }
   0x7   :  { %5460 = sst [smem:[#allocation25_spill]] %s5434_s6 }
   0x8   :  { %28 = vsyncpa [#allocation3], 0 }
   0x9   :  { %29 = vsyncpa [#allocation6], 0 }
   0xa   :  { %30 = vsyncpa [#allocation9], 0 }
   0xb   :  { %31 = vsyncpa [#allocation4], 0 }
   0xc   :  { %32 = vsyncpa [#allocation12], 0  ;;  %s4546_s3 = smov [#allocation5]   ;;  %s4547_s29 = smov [#allocation2]  }
   0xd   :  { %s52_s28 = sshll.u32 %s4546_s3, 4  ;;  %s38_s30 = sshll.u32 %s4547_s29, 4  ;;  %s53_s28 = int_to_ptr.vmem [resolvable:$true] %s52_s28  ;;  %s39_s30 = int_to_ptr.vmem [resolvable:$true] %s38_s30 }
   0xe   :  { %s4404_s4 = scalar_lea.vmem %s53_s28, 256  ;;  %p4409_p1 = scmp.lt.s32.totalorder %s53_s28, %s53_s28 }
   0xf   :  { %p4405_p0 = scmp.ne.s32.totalorder %s53_s28, %s4404_s4  ;;  %p4410_p2 = scmp.lt.s32.totalorder %s4404_s4, %s4404_s4 }
  0x11   :  { %p4411_p3 = por %p4410_p2, %p4409_p1 }
  0x13   :  { %p4412_p4 = pnand %p4411_p3, %p4405_p0 }
  0x15   :  { %4415 = shalt.err (!%p4412_p4)
}
  0x16   :  { %s4548_s0 = smov 128   ;;  %s4549_s23 = smov 8  }
  0x17   :  { %s5461_s24 = sld [smem:[#allocation21_spill]]  ;;  %s4424_s6 = scalar_lea.vmem %s39_s30, 256 }
  0x18   :  { %p4425_p5 = scmp.ne.s32.totalorder %s39_s30, %s4424_s6  ;;  %p4429_p6 = scmp.lt.s32.totalorder %s39_s30, %s39_s30 }
  0x19   :  { %p4430_p7 = scmp.lt.s32.totalorder %s4424_s6, %s4424_s6 }
  0x1b   :  { %p4431_p8 = por %p4430_p7, %p4429_p6 }
  0x1d   :  { %58 = dma.hbm_to_vmem [thread:$0]  %s5461_s24, 256, %s53_s28, [#allocation6], %s4548_s0, %s4548_s0, %s4549_s23  }
  0x1e   :  { %p4432_p9 = pnand %p4431_p8, %p4425_p5 }
  0x20   :  { %4435 = shalt.err (!%p4432_p9)
}
  0x21   :  { %s5462_s2 = sld [smem:[#allocation19_spill]]  ;;  %s4550_s27 = smov [#allocation7]  }
  0x22   :  { %s64_s3 = sshll.u32 %s4550_s27, 4  ;;  %s4551_s29 = smov [#allocation8]   ;;  %s65_s3 = int_to_ptr.vmem [resolvable:$true] %s64_s3 }
  0x23   :  { %s96_s4 = sshll.u32 %s4551_s29, 4  ;;  %s4444_s28 = scalar_lea.vmem %s65_s3, 256  ;;  %s97_s4 = int_to_ptr.vmem [resolvable:$true] %s96_s4 }
  0x24   :  { %p4445_p10 = scmp.ne.s32.totalorder %s65_s3, %s4444_s28  ;;  %p4449_p11 = scmp.lt.s32.totalorder %s65_s3, %s65_s3 }
  0x25   :  { %p4450_p12 = scmp.lt.s32.totalorder %s4444_s28, %s4444_s28 }
  0x27   :  { %44 = dma.hbm_to_vmem [thread:$0]  %s5462_s2, 256, %s39_s30, [#allocation3], %s4548_s0, %s4548_s0, %s4549_s23  }
  0x28   :  { %p4451_p13 = por %p4450_p12, %p4449_p11 }
  0x2a   :  { %p4452_p0 = pnand %p4451_p13, %p4445_p10 }
  0x2c   :  { %4455 = shalt.err (!%p4452_p0)
}
  0x2d   :  { %s5463_s24 = sld [smem:[#allocation22_spill]]  ;;  %s4464_s30 = scalar_lea.vmem %s97_s4, 512 }
  0x2e   :  { %p4465_p1 = scmp.ne.s32.totalorder %s97_s4, %s4464_s30  ;;  %p4469_p2 = scmp.lt.s32.totalorder %s97_s4, %s97_s4 }
  0x2f   :  { %p4470_p3 = scmp.lt.s32.totalorder %s4464_s30, %s4464_s30 }
  0x31   :  { %p4471_p4 = por %p4470_p3, %p4469_p2 }
  0x33   :  { %70 = dma.hbm_to_vmem [thread:$0]  %s5463_s24, 256, %s65_s3, [#allocation6], %s4548_s0, %s4548_s0, %s4549_s23  }
  0x34   :  { %p4472_p5 = pnand %p4471_p4, %p4465_p1 }
  0x36   :  { %4475 = shalt.err (!%p4472_p5)
}
  0x37   :  { %102 = dma.hbm_to_vmem [thread:$0]  %s5442_s14, 512, %s97_s4, [#allocation9], %s4548_s0, %s4548_s0, %s4549_s23  }
  0x38   :  { %4536 = dma.done.wait [#allocation3], 256  }
  0x39   :  { %4537 = vsyncadd [#allocation3], 4294967040 }
  0x3a   :  { %4538 = dma.done.wait [#allocation6], 512  }
  0x3b   :  { %4539 = vsyncadd [#allocation6], 4294966784 }
  0x3c   :  { %4540 = dma.done.wait [#allocation9], 512  }
  0x3d   :  { %4541 = vsyncadd [#allocation9], 4294966784  ;;  %vm188_vm0 = vcmask 261120   ;;  %s5464_s27 = sld [smem:[#allocation23_spill]]  ;;  %v4709_v2 = vld [vmem:[#allocation2] sm:$0xff]  ;;  %v4719_v5 = vld [vmem:[#allocation2 + $0x8] sm:$0xff] }
  0x3e   :  { %4022 = vmatprep.mubr.msk.f32.mxu0 %vm188_vm0, %v4709_v2  ;;  %v4552_v7 = vmov 0.0   ;;  %s5465_s30 = sld [smem:[#allocation24_spill]]  ;;  %s4553_s6 = smov 104   ;;  %vm4555_vm1 = vmmov 0   ;;  %vm286_vm2 = vcmask 64512   ;;  %v172_v26 = vld [vmem:[#allocation5] sm:$0xff] }
  0x3f   :  { %4030 = vmatprep.subr.mxu1 %v4552_v7  ;;  %s4554_s25 = smov 120   ;;  %4032 = vmatprep.mubr.msk.f32.mxu1 %vm4555_vm1, %v4552_v7  ;;  %s4556_s26 = smov 112   ;;  %vm901_vm3 = vcmp.lt.f32.partialorder %v172_v26, 0.5  ;;  %v173_v41 = vld [vmem:[#allocation5 + $0x8] sm:$0xff]  ;;  %vm1633_vm5 = vcmask 130048   ;;  %vm1636_vm6 = vcmask 195584  }
  0x40   :  { %s4557_s2 = smov 96   ;;  %vm902_vm4 = vcmp.lt.f32.partialorder %v173_v41, 0.5  ;;  %s5466_s14 = sld [smem:[#allocation25_spill]]  ;;  %vm2740_vm7 = vcmask 1043456   ;;  %vm2643_vm9 = vcmask 97280   ;;  %vm3617_vm11 = vcmask 523264  }
  0x41   :  { %s4559_s1 = smov 16   ;;  %s4560_s3 = smov 24  }
  0x43   :  { %v128_v0 = vld [vmem:[%s5464_s27 + $0x18] sm:$0xff]  ;;  %v127_v1 = vld [vmem:[%s5464_s27 + $0x10] sm:$0xff]  ;;  %v126_v3 = vld [vmem:[%s5464_s27 + $0x8] sm:$0xff] }
  0x44   :  { %4014 = vmatprep.subr.mxu0 %v128_v0  ;;  %v125_v4 = vld [vmem:[%s5464_s27] sm:$0xff]  ;;  %s4558_s27 = smov 64  }
  0x45   :  { %4015 = vmatpush3.msra.mxu0 %v128_v0  ;;  %v3799_v8 = vld [vmem:[%s5465_s30] ss:$0 sm:$0xff] }
  0x46   :  { %4016 = vmatprep.subr.mxu0 %v127_v1 }
  0x47   :  { %4017 = vmatpush3.msra.mxu0 %v127_v1 }
  0x48   :  { %4018 = vmatprep.subr.mxu0 %v126_v3 }
  0x49   :  { %4019 = vmatpush3.msra.mxu0 %v126_v3 }
  0x4a   :  { %4020 = vmatprep.subr.mxu0 %v125_v4 }
  0x4b   :  { %4021 = vmatpush3.msra.mxu0 %v125_v4 }
  0x4c   :  { %4023 = vmatmul.mubr.msk.f32.vlgmr.msra.gmra.mxu0 %vm188_vm0, %v4719_v5  ;;  %4025 = vmatprep.subr.mxu0 %v4552_v7 }
  0x4d   :  { %4027 = vmatprep.mubr.msk.f32.mxu0 %vm4555_vm1, %v4552_v7 }
 0x10c   :  { %v4024_v6 = vpop.f32.mrf.mxu0 }
 0x10d   :  { %v4738_v11 = vadd.f32 %v4024_v6, %v3799_v8 }
 0x10e   :  { %v261_v9 = vpop.f32.mrf.mxu0 }
 0x10f   :  { %v4728_v10 = vadd.f32 %v3799_v8, %v261_v9 }
 0x111   :  { %280 = vrot.lane.b32.xlu1 %v4728_v10, %s4553_s6  ;;  %272 = vrot.lane.b32.xlu0 %v4728_v10, %s4554_s25 }
 0x115   :  { %274 = vrot.lane.b32.xlu1 %v4738_v11, %s4554_s25  ;;  %276 = vrot.lane.b32.xlu0 %v4728_v10, %s4556_s26 }
 0x119   :  { %282 = vrot.lane.b32.xlu1 %v4738_v11, %s4553_s6  ;;  %278 = vrot.lane.b32.xlu0 %v4738_v11, %s4556_s26 }
 0x11d   :  { %284 = vrot.lane.b32.xlu0 %v4728_v10, %s4557_s2 }
 0x183   :  { %v4750_v12 = vpop.permute.xlu1 %280  ;;  %v4752_v13 = vpop.permute.xlu0 %272 }
 0x184   :  { %361 = vrot.lane.b32.xlu1 %v4752_v13, %s4557_s2 }
 0x187   :  { %v4756_v14 = vpop.permute.xlu0 %276  ;;  %v4762_v15 = vpop.permute.xlu1 %274 }
 0x188   :  { %513 = vrot.lane.b32.xlu1 %v4750_v12, %s4557_s2  ;;  %437 = vrot.lane.b32.xlu0 %v4756_v14, %s4557_s2 }
 0x18b   :  { %v4764_v16 = vpop.permute.xlu0 %278  ;;  %v4770_v17 = vpop.permute.xlu1 %282 }
 0x18c   :  { %665 = vrot.lane.b32.xlu1 %v4762_v15, %s4557_s2  ;;  %589 = vrot.lane.b32.xlu0 %v4738_v11, %s4557_s2 }
 0x18f   :  { %v285_v18 = vpop.permute.xlu0 %284 }
 0x190   :  { %817 = vrot.lane.b32.xlu1 %v4770_v17, %s4557_s2  ;;  %741 = vrot.lane.b32.xlu0 %v4764_v16, %s4557_s2 }
 0x191   :  { %4026 = vmatpush3.xpose.msk.msra.mxu0 %vm286_vm2, %v285_v18 }
 0x192   :  { %4035 = vmatprep.subr.mxu0 %v4552_v7 }
 0x194   :  { %4028 = vmatmul.mubr.msk.f32.vlgmr.msra.gmra.mxu0 %vm286_vm2, %v4728_v10 }
 0x195   :  { %4037 = vmatprep.mubr.msk.f32.mxu0 %vm4555_vm1, %v4552_v7 }
 0x1f6   :  { %v362_v19 = vpop.permute.xlu1 %361 }
 0x1f7   :  { %4031 = vmatpush3.xpose.msk.msra.mxu1 %vm286_vm2, %v362_v19 }
 0x1f8   :  { %4040 = vmatprep.subr.mxu1 %v4552_v7 }
 0x1fa   :  { %4033 = vmatmul.mubr.msk.f32.vlgmr.msra.gmra.mxu1 %vm286_vm2, %v4752_v13  ;;  %v514_v20 = vpop.permute.xlu1 %513  ;;  %v438_v21 = vpop.permute.xlu0 %437 }
 0x1fb   :  { %4036 = vmatpush3.xpose.msk.msra.mxu0 %vm286_vm2, %v438_v21  ;;  %4041 = vmatpush3.xpose.msk.msra.mxu1 %vm286_vm2, %v514_v20 }
 0x1fc   :  { %4042 = vmatprep.mubr.msk.f32.mxu1 %vm4555_vm1, %v4552_v7  ;;  %4050 = vmatprep.subr.mxu1 %v4552_v7 }
 0x1fd   :  { %4045 = vmatprep.subr.mxu0 %v4552_v7 }
 0x1fe   :  { %4043 = vmatmul.mubr.msk.f32.vlgmr.msra.gmra.mxu1 %vm286_vm2, %v4750_v12  ;;  %v666_v22 = vpop.permute.xlu1 %665  ;;  %4038 = vmatmul.mubr.msk.f32.vlgmr.msra.gmra.mxu0 %vm286_vm2, %v4756_v14  ;;  %v590_v23 = vpop.permute.xlu0 %589 }
 0x1ff   :  { %4046 = vmatpush3.xpose.msk.msra.mxu0 %vm286_vm2, %v590_v23  ;;  %4051 = vmatpush3.xpose.msk.msra.mxu1 %vm286_vm2, %v666_v22 }
 0x200   :  { %4047 = vmatprep.mubr.msk.f32.mxu0 %vm4555_vm1, %v4552_v7  ;;  %4052 = vmatprep.mubr.msk.f32.mxu1 %vm4555_vm1, %v4552_v7 }
 0x201   :  { %4060 = vmatprep.subr.mxu1 %v4552_v7  ;;  %4055 = vmatprep.subr.mxu0 %v4552_v7 }
 0x202   :  { %4053 = vmatmul.mubr.msk.f32.vlgmr.msra.gmra.mxu1 %vm286_vm2, %v4762_v15  ;;  %v818_v24 = vpop.permute.xlu1 %817  ;;  %4048 = vmatmul.mubr.msk.f32.vlgmr.msra.gmra.mxu0 %vm286_vm2, %v4738_v11  ;;  %v742_v25 = vpop.permute.xlu0 %741 }
 0x203   :  { %4056 = vmatpush3.xpose.msk.msra.mxu0 %vm286_vm2, %v742_v25  ;;  %4061 = vmatpush3.xpose.msk.msra.mxu1 %vm286_vm2, %v818_v24 }
 0x204   :  { %4057 = vmatprep.mubr.msk.f32.mxu0 %vm4555_vm1, %v4552_v7  ;;  %4062 = vmatprep.mubr.msk.f32.mxu1 %vm4555_vm1, %v4552_v7 }
 0x205   :  { %4065 = vmatprep.subr.mxu0 %v4552_v7  ;;  %4070 = vmatprep.subr.mxu1 %v4552_v7 }
 0x206   :  { %4058 = vmatmul.mubr.msk.f32.vlgmr.msra.gmra.mxu0 %vm286_vm2, %v4764_v16  ;;  %4063 = vmatmul.mubr.msk.f32.vlgmr.msra.gmra.mxu1 %vm286_vm2, %v4770_v17 }
 0x207   :  { %4067 = vmatprep.mubr.msk.f32.mxu0 %vm4555_vm1, %v4552_v7  ;;  %4072 = vmatprep.mubr.msk.f32.mxu1 %vm4555_vm1, %v4552_v7 }
 0x254   :  { %v357_v27 = vpop.f32.mrf.mxu0 }
 0x255   :  { %v893_v28 = vmul.f32 0.35355338, %v357_v27 }
 0x256   :  { %v4029_v29 = vpop.f32.mrf.mxu0 }
 0x257   :  { %v903_v30 = vsel %vm901_vm3, -1e+09, %v893_v28 }
 0x258   :  { %v911_v31 = vsel %vm286_vm2, %v903_v30, -inf }
 0x259   :  { %912 = vmax.xlane.f32.xlu0 %v911_v31 }
 0x2ba   :  { %v433_v32 = vpop.f32.mrf.mxu1 }
 0x2bb   :  { %v894_v33 = vmul.f32 0.35355338, %v433_v32 }
 0x2bc   :  { %v4034_v34 = vpop.f32.mrf.mxu1 }
 0x2bd   :  { %v904_v35 = vsel %vm901_vm3, -1e+09, %v894_v33 }
 0x2be   :  { %v509_v36 = vpop.f32.mrf.mxu0  ;;  %v585_v37 = vpop.f32.mrf.mxu1  ;;  %v914_v38 = vsel %vm286_vm2, %v904_v35, -inf }
 0x2bf   :  { %v895_v39 = vmul.f32 0.35355338, %v509_v36  ;;  %v896_v40 = vmul.f32 0.35355338, %v585_v37  ;;  %915 = vmax.xlane.f32.xlu1 %v914_v38 }
 0x2c0   :  { %v4039_v42 = vpop.f32.mrf.mxu0  ;;  %v4044_v43 = vpop.f32.mrf.mxu1 }
 0x2c1   :  { %v905_v44 = vsel %vm901_vm3, -1e+09, %v895_v39  ;;  %v906_v50 = vsel %vm901_vm3, -1e+09, %v896_v40 }
 0x2c2   :  { %v661_v45 = vpop.f32.mrf.mxu0  ;;  %v737_v46 = vpop.f32.mrf.mxu1  ;;  %v917_v47 = vsel %vm286_vm2, %v905_v44, -inf  ;;  %v920_v56 = vsel %vm286_vm2, %v906_v50, -inf }
 0x2c3   :  { %v897_v48 = vmul.f32 0.35355338, %v661_v45  ;;  %v898_v49 = vmul.f32 0.35355338, %v737_v46  ;;  %918 = vmax.xlane.f32.xlu0 %v917_v47 }
 0x2c4   :  { %v4049_v51 = vpop.f32.mrf.mxu0  ;;  %v4054_v52 = vpop.f32.mrf.mxu1 }
 0x2c5   :  { %v907_v53 = vsel %vm902_vm4, -1e+09, %v897_v48  ;;  %v908_v60 = vsel %vm902_vm4, -1e+09, %v898_v49 }
 0x2c6   :  { %v813_v54 = vpop.f32.mrf.mxu0  ;;  %v889_v55 = vpop.f32.mrf.mxu1  ;;  %v923_v57 = vsel %vm286_vm2, %v907_v53, -inf  ;;  %v926_v0 = vsel %vm286_vm2, %v908_v60, -inf }
 0x2c7   :  { %v899_v58 = vmul.f32 0.35355338, %v813_v54  ;;  %v900_v59 = vmul.f32 0.35355338, %v889_v55  ;;  %921 = vmax.xlane.f32.xlu0 %v920_v56  ;;  %924 = vmax.xlane.f32.xlu1 %v923_v57 }
 0x2c8   :  { %v4059_v61 = vpop.f32.mrf.mxu0  ;;  %v4064_v62 = vpop.f32.mrf.mxu1 }
 0x2c9   :  { %v909_v63 = vsel %vm902_vm4, -1e+09, %v899_v58  ;;  %v910_v3 = vsel %vm902_vm4, -1e+09, %v900_v59 }
 0x2ca   :  { %v929_v1 = vsel %vm286_vm2, %v909_v63, -inf  ;;  %v932_v4 = vsel %vm286_vm2, %v910_v3, -inf }
 0x2cb   :  { %927 = vmax.xlane.f32.xlu0 %v926_v0  ;;  %930 = vmax.xlane.f32.xlu1 %v929_v1 }
 0x2cf   :  { %933 = vmax.xlane.f32.xlu0 %v932_v4 }
 0x2dc   :  { %999 = vrot.lane.b32.xlu1 %v4728_v10, %s4558_s27 }
 0x2e0   :  { %1151 = vrot.lane.b32.xlu1 %v4756_v14, %s4558_s27 }
 0x2e2   :  { %v913_v6 = vpop.xlane.xlu0 %912 }
 0x2e3   :  { %v935_v8 = vsub.f32 %v903_v30, %v913_v6 }
 0x2e4   :  { %1227 = vrot.lane.b32.xlu1 %v4750_v12, %s4558_s27 }
 0x2e5   :  { %1075 = vrot.lane.b32.xlu0 %v4752_v13, %s4558_s27  ;;  %v943_v9 = vmul.f32 1.442695, %v935_v8 }
 0x2e7   :  { %4318 = vpow2.f32 %v943_v9 }
 0x2e8   :  { %1379 = vrot.lane.b32.xlu1 %v4762_v15, %s4558_s27 }
 0x2e9   :  { %1303 = vrot.lane.b32.xlu0 %v4738_v11, %s4558_s27 }
 0x2f4   :  { %v4852_v10 = vpop.eup %4318 }
 0x2f5   :  { %v959_v14 = vsel %vm286_vm2, %v4852_v10, 0.0 }
 0x30c   :  { %960 = vadd.xlane.f32.xlu1 %v959_v14 }
 0x348   :  { %v916_v12 = vpop.xlane.xlu1 %915 }
 0x349   :  { %v936_v18 = vsub.f32 %v904_v35, %v916_v12 }
 0x34b   :  { %v945_v19 = vmul.f32 1.442695, %v936_v18 }
 0x34c   :  { %v919_v13 = vpop.xlane.xlu0 %918 }
 0x34d   :  { %4320 = vpow2.f32 %v945_v19  ;;  %v937_v20 = vsub.f32 %v905_v44, %v919_v13 }
 0x34f   :  { %v947_v15 = vmul.f32 1.442695, %v937_v20 }
 0x350   :  { %v925_v21 = vpop.xlane.xlu1 %924  ;;  %v922_v22 = vpop.xlane.xlu0 %921 }
 0x351   :  { %4322 = vpow2.f32 %v947_v15  ;;  %v939_v11 = vsub.f32 %v907_v53, %v925_v21  ;;  %v938_v23 = vsub.f32 %v906_v50, %v922_v22 }
 0x353   :  { %v951_v24 = vmul.f32 1.442695, %v939_v11  ;;  %v949_v25 = vmul.f32 1.442695, %v938_v23  ;;  %v133_v23 = vld [vmem:[%s5466_s14 + $0x18] sm:$0xff] }
 0x354   :  { %v931_v26 = vpop.xlane.xlu1 %930  ;;  %v928_v27 = vpop.xlane.xlu0 %927 }
 0x355   :  { %4324 = vpow2.f32 %v951_v24  ;;  %v941_v28 = vsub.f32 %v909_v63, %v931_v26  ;;  %v940_v29 = vsub.f32 %v908_v60, %v928_v27  ;;  %v132_v24 = vld [vmem:[%s5466_s14 + $0x10] sm:$0xff]  ;;  %v131_v27 = vld [vmem:[%s5466_s14 + $0x8] sm:$0xff] }
 0x356   :  { %4326 = vpow2.f32 %v949_v25 }
 0x357   :  { %v955_v30 = vmul.f32 1.442695, %v941_v28  ;;  %v953_v31 = vmul.f32 1.442695, %v940_v29  ;;  %v130_v28 = vld [vmem:[%s5466_s14] sm:$0xff] }
 0x358   :  { %v1000_v32 = vpop.permute.xlu1 %999  ;;  %v934_v33 = vpop.xlane.xlu0 %933 }
 0x359   :  { %4328 = vpow2.f32 %v955_v30  ;;  %v942_v34 = vsub.f32 %v910_v3, %v934_v33  ;;  %4066 = vmatpush3.msra.mxu0 %v1000_v32 }
 0x35a   :  { %v4321_v35 = vpop.eup %4320  ;;  %4330 = vpow2.f32 %v953_v31  ;;  %4075 = vmatprep.subr.mxu0 %v4552_v7 }
 0x35b   :  { %v957_v36 = vmul.f32 1.442695, %v942_v34  ;;  %v962_v37 = vsel %vm286_vm2, %v4321_v35, 0.0 }
 0x35c   :  { %963 = vadd.xlane.f32.xlu0 %v962_v37  ;;  %v1076_v38 = vpop.permute.xlu0 %1075  ;;  %v1152_v51 = vpop.permute.xlu1 %1151 }
 0x35d   :  { %4332 = vpow2.f32 %v957_v36  ;;  %4071 = vmatpush3.msra.mxu1 %v1076_v38 }
 0x35e   :  { %v4323_v39 = vpop.eup %4322  ;;  %4080 = vmatprep.subr.mxu1 %v4552_v7 }
 0x35f   :  { %v965_v40 = vsel %vm286_vm2, %v4323_v39, 0.0 }
 0x360   :  { %966 = vadd.xlane.f32.xlu1 %v965_v40  ;;  %v1228_v52 = vpop.permute.xlu1 %1227 }
 0x362   :  { %v4325_v41 = vpop.eup %4324 }
 0x363   :  { %v4327_v42 = vpop.eup %4326  ;;  %v971_v43 = vsel %vm286_vm2, %v4325_v41, 0.0 }
 0x364   :  { %972 = vadd.xlane.f32.xlu1 %v971_v43  ;;  %v968_v44 = vsel %vm286_vm2, %v4327_v42, 0.0  ;;  %v1380_v53 = vpop.permute.xlu1 %1379 }
 0x365   :  { %969 = vadd.xlane.f32.xlu0 %v968_v44 }
 0x366   :  { %v4862_v45 = vpop.eup %4328 }
 0x367   :  { %v4864_v46 = vpop.eup %4330  ;;  %v977_v47 = vsel %vm286_vm2, %v4862_v45, 0.0 }
 0x368   :  { %978 = vadd.xlane.f32.xlu1 %v977_v47  ;;  %v974_v48 = vsel %vm286_vm2, %v4864_v46, 0.0 }
 0x369   :  { %975 = vadd.xlane.f32.xlu0 %v974_v48 }
 0x36a   :  { %v4870_v49 = vpop.eup %4332 }
 0x36b   :  { %v980_v50 = vsel %vm286_vm2, %v4870_v49, 0.0 }
 0x36d   :  { %981 = vadd.xlane.f32.xlu0 %v980_v50 }
 0x379   :  { %1531 = vrot.lane.b32.xlu1 %v4770_v17, %s4558_s27  ;;  %v1304_v17 = vpop.permute.xlu0 %1303 }
 0x383   :  { %1455 = vrot.lane.b32.xlu0 %v4764_v16, %s4558_s27  ;;  %s5467_s27 = sld [smem:[#allocation20_spill]] }
 0x395   :  { %v961_v54 = vpop.xlane.xlu1 %960 }
 0x396   :  { %4334 = vrcp.f32 %v961_v54 }
 0x3a3   :  { %v4335_v55 = vpop.eup %4334 }
 0x3a4   :  { %v991_v56 = vmul.f32 %v4335_v55, %v4852_v10 }
 0x3a6   :  { %4068 = vmatmul.mubr.msk.f32.vlgmr.msra.gmra.mxu0 %vm286_vm2, %v991_v56  ;;  %3733 = vst.msk [vmem:[#allocation11] sm:$0xff] %vm286_vm2, %v991_v56 }
 0x3a7   :  { %4076 = vmatpush3.msra.mxu0 %v1152_v51  ;;  %4077 = vmatprep.mubr.msk.f32.mxu0 %vm4555_vm1, %v4552_v7 }
 0x3a8   :  { %4085 = vmatprep.subr.mxu0 %v4552_v7 }
 0x3e5   :  { %v964_v16 = vpop.xlane.xlu0 %963 }
 0x3e6   :  { %4336 = vrcp.f32 %v964_v16 }
 0x3e9   :  { %v967_v57 = vpop.xlane.xlu1 %966 }
 0x3ea   :  { %4338 = vrcp.f32 %v967_v57 }
 0x3ed   :  { %v973_v58 = vpop.xlane.xlu1 %972 }
 0x3ee   :  { %4340 = vrcp.f32 %v973_v58  ;;  %v970_v59 = vpop.xlane.xlu0 %969 }
 0x3ef   :  { %4342 = vrcp.f32 %v970_v59  ;;  %v143_v59 = vld [vmem:[%s5438_s10 + $0x18] sm:$0xff] }
 0x3f1   :  { %v979_v60 = vpop.xlane.xlu1 %978 }
 0x3f2   :  { %4344 = vrcp.f32 %v979_v60  ;;  %v976_v61 = vpop.xlane.xlu0 %975  ;;  %v142_v60 = vld [vmem:[%s5438_s10 + $0x10] sm:$0xff] }
 0x3f3   :  { %v4337_v62 = vpop.eup %4336  ;;  %4346 = vrcp.f32 %v976_v61 }
 0x3f4   :  { %v992_v63 = vmul.f32 %v4337_v62, %v4321_v35  ;;  %v140_v62 = vld [vmem:[%s5438_s10] sm:$0xff] }
 0x3f5   :  { %v1532_v13 = vpop.permute.xlu1 %1531 }
 0x3f6   :  { %v982_v0 = vpop.xlane.xlu0 %981  ;;  %4073 = vmatmul.mubr.msk.f32.vlgmr.msra.gmra.mxu1 %vm286_vm2, %v992_v63  ;;  %3734 = vst.msk [vmem:[#allocation11 + $0x8] sm:$0xff] %vm286_vm2, %v992_v63 }
 0x3f7   :  { %v4339_v1 = vpop.eup %4338  ;;  %4348 = vrcp.f32 %v982_v0  ;;  %4081 = vmatpush3.msra.mxu1 %v1228_v52  ;;  %4082 = vmatprep.mubr.msk.f32.mxu1 %vm4555_vm1, %v4552_v7  ;;  %v3826_v52 = vld [vmem:[%s5435_s7] ss:$0 sm:$0xff]  ;;  %v169_v0 = vld [vmem:[%s5467_s27 + $0x8] sm:$0xf] }
 0x3f8   :  { %v993_v3 = vmul.f32 %v4339_v1, %v4323_v39  ;;  %4090 = vmatprep.subr.mxu1 %v4552_v7  ;;  %v170_v1 = vld [vmem:[%s5467_s27 + $0x10] sm:$0xff] }
 0x3fa   :  { %4078 = vmatmul.mubr.msk.f32.vlgmr.msra.gmra.mxu0 %vm286_vm2, %v993_v3  ;;  %3735 = vst.msk [vmem:[#allocation11 + $0x10] sm:$0xff] %vm286_vm2, %v993_v3  ;;  %v1456_v10 = vpop.permute.xlu0 %1455  ;;  %v1865_v3 = vcombine.low %v169_v0, %v170_v1 }
 0x3fb   :  { %v4341_v4 = vpop.eup %4340  ;;  %4086 = vmatpush3.msra.mxu0 %v1304_v17  ;;  %4087 = vmatprep.mubr.msk.f32.mxu0 %vm4555_vm1, %v4552_v7 }
 0x3fc   :  { %v4343_v6 = vpop.eup %4342  ;;  %4095 = vmatprep.subr.mxu0 %v4552_v7  ;;  %v995_v8 = vmul.f32 %v4341_v4, %v4325_v41 }
 0x3fd   :  { %v994_v9 = vmul.f32 %v4343_v6, %v4327_v42 }
 0x3fe   :  { %4088 = vmatmul.mubr.msk.f32.vlgmr.msra.gmra.mxu0 %vm286_vm2, %v995_v8  ;;  %3737 = vst.msk [vmem:[#allocation11 + $0x20] sm:$0xff] %vm286_vm2, %v995_v8 }
 0x3ff   :  { %v4345_v14 = vpop.eup %4344  ;;  %4083 = vmatmul.mubr.msk.f32.vlgmr.msra.gmra.mxu1 %vm286_vm2, %v994_v9  ;;  %3736 = vst.msk [vmem:[#allocation11 + $0x18] sm:$0xff] %vm286_vm2, %v994_v9  ;;  %4096 = vmatpush3.msra.mxu0 %v1456_v10 }
 0x400   :  { %v4347_v12 = vpop.eup %4346  ;;  %4091 = vmatpush3.msra.mxu1 %v1380_v53  ;;  %4092 = vmatprep.mubr.msk.f32.mxu1 %vm4555_vm1, %v4552_v7  ;;  %v997_v18 = vmul.f32 %v4345_v14, %v4862_v45 }
 0x401   :  { %4097 = vmatprep.mubr.msk.f32.mxu0 %vm4555_vm1, %v4552_v7  ;;  %4100 = vmatprep.subr.mxu1 %v4552_v7  ;;  %v996_v19 = vmul.f32 %v4347_v12, %v4864_v46 }
 0x402   :  { %4098 = vmatmul.mubr.msk.f32.vlgmr.msra.gmra.mxu0 %vm286_vm2, %v997_v18  ;;  %3739 = vst.msk [vmem:[#allocation11 + $0x30] sm:$0xff] %vm286_vm2, %v997_v18  ;;  %4105 = vmatprep.subr.mxu0 %v133_v23 }
 0x403   :  { %4093 = vmatmul.mubr.msk.f32.vlgmr.msra.gmra.mxu1 %vm286_vm2, %v996_v19  ;;  %3738 = vst.msk [vmem:[#allocation11 + $0x28] sm:$0xff] %vm286_vm2, %v996_v19  ;;  %4106 = vmatpush3.msra.mxu0 %v133_v23  ;;  %v136_v23 = vld [vmem:[%s5436_s8 + $0x8] sm:$0xff] }
 0x404   :  { %v4349_v20 = vpop.eup %4348  ;;  %4101 = vmatpush3.msra.mxu1 %v1532_v13  ;;  %4102 = vmatprep.mubr.msk.f32.mxu1 %vm4555_vm1, %v4552_v7 }
 0x405   :  { %v998_v15 = vmul.f32 %v4349_v20, %v4870_v49  ;;  %4107 = vmatprep.subr.mxu0 %v132_v24  ;;  %v181_v20 = vcombine.high %v170_v1, %v170_v1 }
 0x406   :  { %4108 = vmatpush3.msra.mxu0 %v132_v24  ;;  %v135_v24 = vld [vmem:[%s5436_s8] sm:$0xff] }
 0x407   :  { %4103 = vmatmul.mubr.msk.f32.vlgmr.msra.gmra.mxu1 %vm286_vm2, %v998_v15  ;;  %3740 = vst.msk [vmem:[#allocation11 + $0x38] sm:$0xff] %vm286_vm2, %v998_v15  ;;  %4109 = vmatprep.subr.mxu0 %v131_v27  ;;  %v171_v15 = vld [vmem:[%s5467_s27 + $0x18] sm:$0xf] }
 0x408   :  { %4110 = vmatpush3.msra.mxu0 %v131_v27 }
 0x409   :  { %4111 = vmatprep.subr.mxu0 %v130_v28 }
 0x40a   :  { %4112 = vmatpush3.msra.mxu0 %v130_v28 }
 0x40b   :  { %4127 = vmatprep.subr.mxu0 %v4552_v7 }
 0x466   :  { %v1071_v21 = vpop.f32.mrf.mxu0 }
 0x468   :  { %v4069_v22 = vpop.f32.mrf.mxu0 }
 0x469   :  { %v138_v22 = vld [vmem:[%s5436_s8 + $0x18] sm:$0xff] }
 0x46a   :  { %4116 = vmatprep.subr.mxu1 %v138_v22 }
 0x46b   :  { %4117 = vmatpush3.msra.mxu1 %v138_v22 }
 0x4b6   :  { %v1147_v11 = vpop.f32.mrf.mxu1 }
 0x4b7   :  { %1609 = vrot.lane.b32.xlu0 %v1147_v11, %s4549_s23  ;;  %v137_v11 = vld [vmem:[%s5436_s8 + $0x10] sm:$0xff] }
 0x4b8   :  { %v4074_v25 = vpop.f32.mrf.mxu1  ;;  %4118 = vmatprep.subr.mxu1 %v137_v11 }
 0x4b9   :  { %4119 = vmatpush3.msra.mxu1 %v137_v11  ;;  %v3834_v25 = vld [vmem:[%s5439_s11] ss:$0 sm:$0xff] }
 0x4ba   :  { %v1223_v26 = vpop.f32.mrf.mxu0  ;;  %4120 = vmatprep.subr.mxu1 %v136_v23 }
 0x4bb   :  { %1617 = vrot.lane.b32.xlu0 %v1223_v26, %s4559_s1  ;;  %4121 = vmatpush3.msra.mxu1 %v136_v23 }
 0x4bc   :  { %v4079_v29 = vpop.f32.mrf.mxu0  ;;  %4122 = vmatprep.subr.mxu1 %v135_v24 }
 0x4bd   :  { %4123 = vmatpush3.msra.mxu1 %v135_v24 }
 0x4be   :  { %v1375_v30 = vpop.f32.mrf.mxu0  ;;  %4144 = vmatprep.subr.mxu1 %v4552_v7 }
 0x4bf   :  { %v1299_v31 = vpop.f32.mrf.mxu1 }
 0x4c0   :  { %1625 = vrot.lane.b32.xlu0 %v1299_v31, %s4560_s3  ;;  %v4089_v32 = vpop.f32.mrf.mxu0 }
 0x4c1   :  { %v4084_v33 = vpop.f32.mrf.mxu1 }
 0x4c2   :  { %v1527_v34 = vpop.f32.mrf.mxu0 }
 0x4c3   :  { %v1451_v35 = vpop.f32.mrf.mxu1 }
 0x4c4   :  { %1611 = vrot.lane.b32.xlu1 %v1451_v35, %s4549_s23  ;;  %v4099_v36 = vpop.f32.mrf.mxu0 }
 0x4c5   :  { %v4094_v37 = vpop.f32.mrf.mxu1 }
 0x4c7   :  { %v1603_v38 = vpop.f32.mrf.mxu1 }
 0x4c8   :  { %1619 = vrot.lane.b32.xlu1 %v1527_v34, %s4559_s1 }
 0x4c9   :  { %v4104_v39 = vpop.f32.mrf.mxu1 }
 0x4cc   :  { %1627 = vrot.lane.b32.xlu1 %v1603_v38, %s4560_s3 }
 0x529   :  { %v1610_v40 = vpop.permute.xlu0 %1609 }
 0x52a   :  { %v1631_v42 = vsel %vm286_vm2, %v1071_v21, %v1610_v40  ;;  %v1866_v21 = vcombine.low %v181_v20, %v171_v15 }
 0x52d   :  { %v1618_v41 = vpop.permute.xlu0 %1617 }
 0x52e   :  { %v1634_v43 = vsel %vm1633_vm5, %v1631_v42, %v1618_v41  ;;  %v5030_v42 = vld [vmem:[%s5446_s18] ss:$0 sm:$0xff] }
 0x532   :  { %v1626_v44 = vpop.permute.xlu0 %1625 }
 0x533   :  { %v1637_v45 = vsel %vm1636_vm6, %v1634_v43, %v1626_v44  ;;  %v5035_v44 = vld [vmem:[%s5447_s19] ss:$0 sm:$0xff] }
 0x534   :  { %4113 = vmatprep.mubr.msk.f32.mxu0 %vm188_vm0, %v1637_v45 }
 0x536   :  { %v1612_v46 = vpop.permute.xlu1 %1611 }
 0x537   :  { %v1632_v48 = vsel %vm286_vm2, %v1375_v30, %v1612_v46 }
 0x53a   :  { %v1620_v47 = vpop.permute.xlu1 %1619 }
 0x53b   :  { %v1635_v49 = vsel %vm1633_vm5, %v1632_v48, %v1620_v47 }
 0x53e   :  { %v1628_v50 = vpop.permute.xlu1 %1627 }
 0x53f   :  { %v1638_v51 = vsel %vm1636_vm6, %v1635_v49, %v1628_v50 }
 0x540   :  { %4114 = vmatmul.mubr.msk.f32.vlgmr.msra.gmra.mxu0 %vm188_vm0, %v1638_v51 }
 0x541   :  { %4135 = vmatprep.mubr.msk.f32.mxu0 %vm4555_vm1, %v4552_v7  ;;  %4128 = vmatpush3.msra.mxu0 %v143_v59 }
 0x542   :  { %4129 = vmatprep.subr.mxu0 %v4552_v7 }
 0x543   :  { %4130 = vmatpush3.msra.mxu0 %v142_v60 }
 0x544   :  { %4131 = vmatprep.subr.mxu0 %v4552_v7 }
 0x600   :  { %v4115_v53 = vpop.f32.mrf.mxu0 }
 0x601   :  { %v1723_v54 = vadd.f32 %v4115_v53, %v3826_v52 }
 0x602   :  { %v1717_v55 = vpop.f32.mrf.mxu0 }
 0x603   :  { %v1718_v56 = vadd.f32 %v3826_v52, %v1717_v55  ;;  %v1727_v17 = vadd.f32 %v1723_v54, %v4719_v5  ;;  %v168_v5 = vld [vmem:[%s5467_s27] sm:$0xff] }
 0x604   :  { %v180_v61 = vcombine.high %v168_v5, %v168_v5 }
 0x605   :  { %v1731_v16 = vsel %vm188_vm0, %v1727_v17, 0.0  ;;  %v1726_v57 = vadd.f32 %v1718_v56, %v4709_v2  ;;  %v141_v2 = vld [vmem:[%s5438_s10 + $0x8] sm:$0xff] }
 0x606   :  { %1732 = vadd.xlane.f32.xlu1 %v1731_v16  ;;  %v1864_v63 = vcombine.low %v168_v5, %v180_v61  ;;  %4132 = vmatpush3.msra.mxu0 %v141_v2  ;;  %v3831_v61 = vld [vmem:[%s5437_s9] ss:$0 sm:$0xff] }
 0x607   :  { %v1728_v58 = vsel %vm188_vm0, %v1726_v57, 0.0  ;;  %4133 = vmatprep.subr.mxu0 %v4552_v7 }
 0x608   :  { %1729 = vadd.xlane.f32.xlu0 %v1728_v58  ;;  %4134 = vmatpush3.msra.mxu0 %v140_v62 }
 0x609   :  { %4136 = vmatmul.mubr.msk.f32.vlgmr.msra.gmra.mxu0 %vm188_vm0, %v1864_v63  ;;  %4158 = vmatprep.subr.mxu0 %v4552_v7 }
 0x60a   :  { %4138 = vmatprep.mubr.msk.f32.mxu0 %vm4555_vm1, %v4552_v7 }
 0x60d   :  { %4139 = vmatmul.mubr.msk.f32.gmra.mxu0 %vm188_vm0, %v1865_v3 }
 0x60e   :  { %4141 = vmatprep.mubr.msk.f32.mxu0 %vm4555_vm1, %v4552_v7 }
 0x611   :  { %4142 = vmatmul.mubr.msk.f32.gmra.mxu0 %vm188_vm0, %v1866_v21 }
 0x612   :  { %4162 = vmatprep.mubr.msk.f32.mxu0 %vm4555_vm1, %v4552_v7 }
 0x68f   :  { %v1733_v4 = vpop.xlane.xlu1 %1732 }
 0x690   :  { %v1736_v6 = vmul.f32 0.03125, %v1733_v4 }
 0x691   :  { %v1730_v8 = vpop.xlane.xlu0 %1729 }
 0x692   :  { %v1735_v9 = vmul.f32 0.03125, %v1730_v8  ;;  %v1738_v10 = vsub.f32 %v1727_v17, %v1736_v6 }
 0x694   :  { %v1737_v14 = vsub.f32 %v1726_v57, %v1735_v9  ;;  %v1740_v19 = vmul.f32 %v1738_v10, %v1738_v10 }
 0x696   :  { %v1739_v12 = vmul.f32 %v1737_v14, %v1737_v14  ;;  %v1744_v13 = vsel %vm188_vm0, %v1740_v19, 0.0 }
 0x698   :  { %v1741_v18 = vsel %vm188_vm0, %v1739_v12, 0.0 }
 0x699   :  { %1742 = vadd.xlane.f32.xlu0 %v1741_v18 }
 0x69d   :  { %1745 = vadd.xlane.f32.xlu0 %v1744_v13 }
 0x6c9   :  { %v1939_v26 = vpop.f32.mrf.mxu0 }
 0x6ca   :  { %v1940_v27 = vadd.f32 %v3834_v25, %v1939_v26 }
 0x6cb   :  { %v4137_v28 = vpop.f32.mrf.mxu0 }
 0x6cc   :  { %v1970_v29 = vcombine.high %v1940_v27, %v1940_v27  ;;  %1973 = vrot.lane.b32.xlu0 %v1940_v27, %s4554_s25 }
 0x6cd   :  { %v1944_v30 = vpop.f32.mrf.mxu0 }
 0x6ce   :  { %v5006_v31 = vadd.f32 %v3834_v25, %v1944_v30  ;;  %v5008_v32 = vcombine.low %v1940_v27, %v1970_v29 }
 0x6cf   :  { %v4140_v33 = vpop.f32.mrf.mxu0 }
 0x6d0   :  { %1977 = vrot.lane.b32.xlu1 %v5006_v31, %s4554_s25  ;;  %1985 = vrot.lane.b32.xlu0 %v1940_v27, %s4556_s26  ;;  %v5023_v34 = vcombine.high %v5006_v31, %v5006_v31 }
 0x6d1   :  { %v1949_v51 = vpop.f32.mrf.mxu0 }
 0x6d2   :  { %v5057_v53 = vadd.f32 %v3834_v25, %v1949_v51 }
 0x6d3   :  { %v4143_v52 = vpop.f32.mrf.mxu0 }
 0x6d4   :  { %1975 = vrot.lane.b32.xlu1 %v1970_v29, %s4554_s25  ;;  %1997 = vrot.lane.b32.xlu0 %v1940_v27, %s4553_s6  ;;  %v5061_v54 = vcombine.high %v5057_v53, %v5057_v53  ;;  %v5144_v21 = vcombine.low %v5023_v34, %v5057_v53 }
 0x6d8   :  { %1989 = vrot.lane.b32.xlu1 %v5006_v31, %s4556_s26  ;;  %1983 = vrot.lane.b32.xlu0 %v5061_v54, %s4554_s25 }
 0x6dc   :  { %2001 = vrot.lane.b32.xlu1 %v5006_v31, %s4553_s6 }
 0x6e0   :  { %1987 = vrot.lane.b32.xlu1 %v1970_v29, %s4556_s26 }
 0x6e4   :  { %1999 = vrot.lane.b32.xlu1 %v1970_v29, %s4553_s6  ;;  %v174_v29 = vld [vmem:[#allocation7] sm:$0xff] }
 0x6e5   :  { %vm2633_vm8 = vcmp.lt.f32.partialorder %v174_v29, 0.5 }
 0x6e8   :  { %1979 = vrot.lane.b32.xlu1 %v5023_v34, %s4554_s25 }
 0x6ec   :  { %1995 = vrot.lane.b32.xlu1 %v5061_v54, %s4556_s26 }
 0x722   :  { %v1743_v35 = vpop.xlane.xlu0 %1742 }
 0x723   :  { %v1747_v36 = vmul.f32 0.03125, %v1743_v35 }
 0x725   :  { %v1749_v37 = vadd.f32 1e-05, %v1747_v36 }
 0x726   :  { %v1746_v38 = vpop.xlane.xlu0 %1745 }
 0x727   :  { %4350 = vrsqrt.f32 %v1749_v37  ;;  %v1748_v39 = vmul.f32 0.03125, %v1746_v38 }
 0x729   :  { %v1750_v40 = vadd.f32 1e-05, %v1748_v39 }
 0x72b   :  { %4352 = vrsqrt.f32 %v1750_v40 }
 0x734   :  { %v4351_v41 = vpop.eup %4350 }
 0x735   :  { %v1753_v43 = vmul.f32 %v4351_v41, %v1737_v14 }
 0x737   :  { %v1761_v45 = vmul.f32 %v5030_v42, %v1753_v43 }
 0x738   :  { %v4353_v46 = vpop.eup %4352 }
 0x739   :  { %v1754_v47 = vmul.f32 %v4353_v46, %v1738_v10  ;;  %v5039_v48 = vadd.f32 %v5035_v44, %v1761_v45 }
 0x73b   :  { %4124 = vmatprep.mubr.msk.f32.mxu1 %vm188_vm0, %v5039_v48  ;;  %v1762_v49 = vmul.f32 %v5030_v42, %v1754_v47 }
 0x73d   :  { %v5045_v50 = vadd.f32 %v5035_v44, %v1762_v49 }
 0x73e   :  { %v1974_v17 = vpop.permute.xlu0 %1973 }
 0x73f   :  { %4125 = vmatmul.mubr.msk.f32.vlgmr.msra.gmra.mxu1 %vm188_vm0, %v5045_v50 }
 0x740   :  { %4145 = vmatpush3.xpose.msk.msra.mxu1 %vm286_vm2, %v5006_v31  ;;  %4148 = vmatprep.mubr.msk.f32.mxu1 %vm4555_vm1, %v4552_v7 }
 0x741   :  { %4146 = vmatprep.subr.mxu1 %v4552_v7 }
 0x742   :  { %v5067_v55 = vpop.permute.xlu1 %1977  ;;  %v1986_v60 = vpop.permute.xlu0 %1985 }
 0x744   :  { %4147 = vmatpush3.xpose.msk.msra.mxu1 %vm286_vm2, %v5008_v32 }
 0x745   :  { %4151 = vmatprep.subr.mxu1 %v4552_v7 }
 0x746   :  { %v1976_v56 = vpop.permute.xlu1 %1975  ;;  %v1998_v3 = vpop.permute.xlu0 %1997 }
 0x747   :  { %v5069_v16 = vcombine.low %v1974_v17, %v1976_v56  ;;  %v175_v56 = vld [vmem:[#allocation7 + $0x8] sm:$0xff] }
 0x748   :  { %vm2634_vm10 = vcmp.lt.f32.partialorder %v175_v56, 0.5 }
 0x74a   :  { %v5071_v57 = vpop.permute.xlu1 %1989  ;;  %v5117_v8 = vpop.permute.xlu0 %1983 }
 0x74b   :  { %4159 = vmatpush3.xpose.msk.msra.mxu0 %vm286_vm2, %v5071_v57 }
 0x74c   :  { %4160 = vmatprep.subr.mxu0 %v4552_v7 }
 0x74e   :  { %v5076_v58 = vpop.permute.xlu1 %2001 }
 0x752   :  { %v1988_v59 = vpop.permute.xlu1 %1987 }
 0x753   :  { %v5078_v5 = vcombine.low %v1986_v60, %v1988_v59 }
 0x755   :  { %4161 = vmatpush3.xpose.msk.msra.mxu0 %vm286_vm2, %v5078_v5 }
 0x756   :  { %4172 = vmatprep.subr.mxu0 %v4552_v7  ;;  %v2000_v1 = vpop.permute.xlu1 %1999 }
 0x757   :  { %v5125_v14 = vcombine.low %v1998_v3, %v2000_v1 }
 0x75a   :  { %v1980_v4 = vpop.permute.xlu1 %1979 }
 0x75e   :  { %v5115_v6 = vpop.permute.xlu1 %1995 }
 0x7ff   :  { %v4126_v2 = vpop.f32.mrf.mxu1 }
 0x800   :  { %v1855_v0 = vadd.f32 %v4126_v2, %v3831_v61 }
 0x801   :  { %v1849_v62 = vpop.f32.mrf.mxu1 }
 0x802   :  { %v1850_v63 = vadd.f32 %v3831_v61, %v1849_v62 }
 0x804   :  { %1963 = vrot.lane.b32.xlu1 %v1850_v63, %s4553_s6  ;;  %1955 = vrot.lane.b32.xlu0 %v1850_v63, %s4554_s25 }
 0x805   :  { %4149 = vmatmul.mubr.msk.f32.vlgmr.msra.gmra.mxu1 %vm286_vm2, %v1850_v63 }
 0x806   :  { %4152 = vmatpush3.xpose.msk.msra.mxu1 %vm286_vm2, %v5067_v55  ;;  %4155 = vmatprep.mubr.msk.f32.mxu1 %vm4555_vm1, %v4552_v7 }
 0x807   :  { %4153 = vmatprep.subr.mxu1 %v4552_v7 }
 0x808   :  { %2007 = vrot.lane.b32.xlu1 %v5061_v54, %s4553_s6  ;;  %1981 = vrot.lane.b32.xlu0 %v5057_v53, %s4554_s25 }
 0x80a   :  { %4154 = vmatpush3.xpose.msk.msra.mxu1 %vm286_vm2, %v5069_v16 }
 0x80b   :  { %4165 = vmatprep.subr.mxu1 %v4552_v7 }
 0x80c   :  { %1993 = vrot.lane.b32.xlu1 %v5057_v53, %s4556_s26  ;;  %1959 = vrot.lane.b32.xlu0 %v1850_v63, %s4556_s26 }
 0x810   :  { %2005 = vrot.lane.b32.xlu1 %v5057_v53, %s4553_s6  ;;  %1957 = vrot.lane.b32.xlu0 %v1855_v0, %s4554_s25 }
 0x814   :  { %1965 = vrot.lane.b32.xlu1 %v1855_v0, %s4553_s6  ;;  %1991 = vrot.lane.b32.xlu0 %v5023_v34, %s4556_s26 }
 0x818   :  { %2734 = vrot.lane.b32.xlu1 %v5006_v31, %s4557_s2  ;;  %2003 = vrot.lane.b32.xlu0 %v5023_v34, %s4553_s6 }
 0x81c   :  { %1961 = vrot.lane.b32.xlu0 %v1855_v0, %s4556_s26 }
 0x876   :  { %v1964_v9 = vpop.permute.xlu1 %1963  ;;  %v1956_v10 = vpop.permute.xlu0 %1955 }
 0x877   :  { %4156 = vmatmul.mubr.msk.f32.vlgmr.msra.gmra.mxu1 %vm286_vm2, %v1956_v10 }
 0x878   :  { %4166 = vmatpush3.xpose.msk.msra.mxu1 %vm286_vm2, %v5076_v58  ;;  %4169 = vmatprep.mubr.msk.f32.mxu1 %vm4555_vm1, %v4552_v7 }
 0x879   :  { %4167 = vmatprep.subr.mxu1 %v4552_v7 }
 0x87a   :  { %v5127_v12 = vpop.permute.xlu1 %2007  ;;  %v1982_v18 = vpop.permute.xlu0 %1981 }
 0x87b   :  { %v5140_v20 = vcombine.low %v1980_v4, %v1982_v18 }
 0x87c   :  { %4168 = vmatpush3.xpose.msk.msra.mxu1 %vm286_vm2, %v5125_v14 }
 0x87d   :  { %4179 = vmatprep.subr.mxu1 %v4552_v7 }
 0x87e   :  { %v1994_v19 = vpop.permute.xlu1 %1993  ;;  %v1960_v13 = vpop.permute.xlu0 %1959 }
 0x87f   :  { %4170 = vmatmul.mubr.msk.f32.vlgmr.msra.gmra.mxu1 %vm286_vm2, %v1964_v9  ;;  %4163 = vmatmul.mubr.msk.f32.vlgmr.msra.gmra.mxu0 %vm286_vm2, %v1960_v13 }
 0x880   :  { %4173 = vmatpush3.xpose.msk.msra.mxu0 %vm286_vm2, %v5061_v54  ;;  %4180 = vmatpush3.xpose.msk.msra.mxu1 %vm286_vm2, %v5117_v8 }
 0x881   :  { %4174 = vmatprep.subr.mxu0 %v4552_v7  ;;  %4181 = vmatprep.subr.mxu1 %v4552_v7 }
 0x882   :  { %v1958_v15 = vpop.permute.xlu0 %1957  ;;  %4176 = vmatprep.mubr.msk.f32.mxu0 %vm4555_vm1, %v4552_v7  ;;  %4183 = vmatprep.mubr.msk.f32.mxu1 %vm4555_vm1, %v4552_v7  ;;  %v2006_v22 = vpop.permute.xlu1 %2005 }
 0x884   :  { %4175 = vmatpush3.xpose.msk.msra.mxu0 %vm286_vm2, %v5144_v21  ;;  %4182 = vmatpush3.xpose.msk.msra.mxu1 %vm286_vm2, %v5140_v20 }
 0x885   :  { %4186 = vmatprep.subr.mxu0 %v4552_v7  ;;  %4193 = vmatprep.subr.mxu1 %v4552_v7 }
 0x886   :  { %v1992_v11 = vpop.permute.xlu0 %1991  ;;  %v1966_v23 = vpop.permute.xlu1 %1965 }
 0x887   :  { %4177 = vmatmul.mubr.msk.f32.vlgmr.msra.gmra.mxu0 %vm286_vm2, %v1855_v0  ;;  %4184 = vmatmul.mubr.msk.f32.vlgmr.msra.gmra.mxu1 %vm286_vm2, %v1958_v15  ;;  %v5164_v24 = vcombine.low %v1992_v11, %v1994_v19 }
 0x888   :  { %4187 = vmatpush3.xpose.msk.msra.mxu0 %vm286_vm2, %v5115_v6  ;;  %4194 = vmatpush3.xpose.msk.msra.mxu1 %vm286_vm2, %v5127_v12 }
 0x889   :  { %4188 = vmatprep.subr.mxu0 %v4552_v7  ;;  %4195 = vmatprep.subr.mxu1 %v4552_v7 }
 0x88a   :  { %v2004_v25 = vpop.permute.xlu0 %2003  ;;  %4190 = vmatprep.mubr.msk.f32.mxu0 %vm4555_vm1, %v4552_v7  ;;  %4197 = vmatprep.mubr.msk.f32.mxu1 %vm4555_vm1, %v4552_v7  ;;  %v2735_v28 = vpop.permute.xlu1 %2734 }
 0x88b   :  { %v5170_v26 = vcombine.low %v2004_v25, %v2006_v22 }
 0x88c   :  { %4189 = vmatpush3.xpose.msk.msra.mxu0 %vm286_vm2, %v5164_v24 }
 0x88d   :  { %4196 = vmatpush3.xpose.msk.msra.mxu1 %vm286_vm2, %v5170_v26  ;;  %4200 = vmatprep.subr.mxu0 %v4552_v7 }
 0x88e   :  { %v1962_v27 = vpop.permute.xlu0 %1961  ;;  %4214 = vmatprep.subr.mxu1 %v4552_v7 }
 0x88f   :  { %4191 = vmatmul.mubr.msk.f32.vlgmr.msra.gmra.mxu0 %vm286_vm2, %v1962_v27 }
 0x890   :  { %4201 = vmatpush3.msk.msra.mxu0 %vm2740_vm7, %v2735_v28  ;;  %4198 = vmatmul.mubr.msk.f32.vlgmr.msra.gmra.mxu1 %vm286_vm2, %v1966_v23 }
 0x891   :  { %4202 = vmatprep.subr.mxu0 %v4552_v7  ;;  %4204 = vmatprep.mubr.msk.f32.mxu0 %vm4555_vm1, %v4552_v7 }
 0x892   :  { %4218 = vmatprep.mubr.msk.f32.mxu1 %vm4555_vm1, %v4552_v7 }
 0x8c5   :  { %v2082_v30 = vpop.f32.mrf.mxu1 }
 0x8c6   :  { %v2625_v31 = vmul.f32 0.35355338, %v2082_v30 }
 0x8c7   :  { %v4150_v33 = vpop.f32.mrf.mxu1 }
 0x8c8   :  { %v2635_v34 = vsel %vm2633_vm8, -1e+09, %v2625_v31 }
 0x8c9   :  { %v2644_v35 = vsel %vm2643_vm9, %v2635_v34, -inf }
 0x8ca   :  { %2645 = vmax.xlane.f32.xlu0 %v2644_v35 }
 0x937   :  { %v2159_v36 = vpop.f32.mrf.mxu1 }
 0x938   :  { %v2626_v37 = vmul.f32 0.35355338, %v2159_v36 }
 0x939   :  { %v4157_v38 = vpop.f32.mrf.mxu1 }
 0x93a   :  { %v5189_v39 = vsel %vm2633_vm8, -1e+09, %v2626_v37 }
 0x93b   :  { %v2647_v40 = vsel %vm2643_vm9, %v5189_v39, -inf }
 0x93c   :  { %2648 = vmax.xlane.f32.xlu1 %v2647_v40 }
 0x93f   :  { %v2313_v41 = vpop.f32.mrf.mxu1  ;;  %v2236_v43 = vpop.f32.mrf.mxu0 }
 0x940   :  { %v2628_v45 = vmul.f32 0.35355338, %v2313_v41  ;;  %v2627_v46 = vmul.f32 0.35355338, %v2236_v43 }
 0x941   :  { %v4171_v47 = vpop.f32.mrf.mxu1  ;;  %v4164_v49 = vpop.f32.mrf.mxu0 }
 0x942   :  { %v2637_v51 = vsel %vm2633_vm8, -1e+09, %v2627_v46  ;;  %v2638_v53 = vsel %vm2633_vm8, -1e+09, %v2628_v45 }
 0x943   :  { %v2650_v52 = vsel %vm2643_vm9, %v2637_v51, -inf  ;;  %v2653_v60 = vsel %vm2643_vm9, %v2638_v53, -inf }
 0x944   :  { %2651 = vmax.xlane.f32.xlu0 %v2650_v52 }
 0x947   :  { %v2390_v17 = vpop.f32.mrf.mxu0  ;;  %v2467_v59 = vpop.f32.mrf.mxu1 }
 0x948   :  { %v2629_v2 = vmul.f32 0.35355338, %v2390_v17  ;;  %v2630_v61 = vmul.f32 0.35355338, %v2467_v59  ;;  %2654 = vmax.xlane.f32.xlu0 %v2653_v60 }
 0x949   :  { %v4178_v62 = vpop.f32.mrf.mxu0  ;;  %v4185_v63 = vpop.f32.mrf.mxu1 }
 0x94a   :  { %v2639_v0 = vsel %vm2634_vm10, -1e+09, %v2629_v2  ;;  %v2640_v1 = vsel %vm2634_vm10, -1e+09, %v2630_v61 }
 0x94b   :  { %v2656_v3 = vsel %vm2643_vm9, %v2639_v0, -inf  ;;  %v2659_v4 = vsel %vm2643_vm9, %v2640_v1, -inf }
 0x94c   :  { %2657 = vmax.xlane.f32.xlu1 %v2656_v3  ;;  %2660 = vmax.xlane.f32.xlu0 %v2659_v4 }
 0x94f   :  { %v2544_v9 = vpop.f32.mrf.mxu0 }
 0x950   :  { %v2631_v10 = vmul.f32 0.35355338, %v2544_v9  ;;  %v2621_v18 = vpop.f32.mrf.mxu1 }
 0x951   :  { %v2632_v19 = vmul.f32 0.35355338, %v2621_v18  ;;  %v4192_v13 = vpop.f32.mrf.mxu0 }
 0x952   :  { %v4199_v15 = vpop.f32.mrf.mxu1  ;;  %v2641_v22 = vsel %vm2634_vm10, -1e+09, %v2631_v10 }
 0x953   :  { %v2662_v11 = vsel %vm2643_vm9, %v2641_v22, -inf  ;;  %v2642_v23 = vsel %vm2634_vm10, -1e+09, %v2632_v19 }
 0x954   :  { %2663 = vmax.xlane.f32.xlu1 %v2662_v11  ;;  %v2665_v25 = vsel %vm2643_vm9, %v2642_v23, -inf }
 0x955   :  { %2666 = vmax.xlane.f32.xlu0 %v2665_v25 }
 0x965   :  { %2815 = vrot.lane.b32.xlu1 %v5067_v55, %s4557_s2 }
 0x969   :  { %2813 = vrot.lane.b32.xlu1 %v5069_v16, %s4557_s2 }
 0x96b   :  { %2732 = vrot.lane.b32.xlu0 %v5008_v32, %s4557_s2  ;;  %v2646_v32 = vpop.xlane.xlu0 %2645 }
 0x96c   :  { %v2668_v55 = vsub.f32 %v2635_v34, %v2646_v32 }
 0x96d   :  { %2975 = vrot.lane.b32.xlu1 %v5076_v58, %s4557_s2 }
 0x96e   :  { %v2676_v16 = vmul.f32 1.442695, %v2668_v55 }
 0x96f   :  { %2895 = vrot.lane.b32.xlu0 %v5071_v57, %s4557_s2 }
 0x970   :  { %4354 = vpow2.f32 %v2676_v16 }
 0x971   :  { %2973 = vrot.lane.b32.xlu1 %v5125_v14, %s4557_s2 }
 0x973   :  { %2893 = vrot.lane.b32.xlu0 %v5078_v5, %s4557_s2 }
 0x975   :  { %3135 = vrot.lane.b32.xlu1 %v5117_v8, %s4557_s2 }
 0x977   :  { %3055 = vrot.lane.b32.xlu0 %v5061_v54, %s4557_s2 }
 0x979   :  { %3133 = vrot.lane.b32.xlu1 %v5140_v20, %s4557_s2 }
 0x97b   :  { %3053 = vrot.lane.b32.xlu0 %v5144_v21, %s4557_s2 }
 0x97d   :  { %3295 = vrot.lane.b32.xlu1 %v5127_v12, %s4557_s2  ;;  %v5231_v57 = vpop.eup %4354 }
 0x97e   :  { %v2692_v54 = vsel %vm2643_vm9, %v5231_v57, 0.0 }
 0x97f   :  { %3215 = vrot.lane.b32.xlu0 %v5115_v6, %s4557_s2 }
 0x9a1   :  { %2693 = vadd.xlane.f32.xlu1 %v2692_v54 }
 0x9c5   :  { %v2649_v58 = vpop.xlane.xlu1 %2648 }
 0x9c6   :  { %v2669_v5 = vsub.f32 %v5189_v39, %v2649_v58 }
 0x9c8   :  { %v2678_v8 = vmul.f32 1.442695, %v2669_v5 }
 0x9ca   :  { %4356 = vpow2.f32 %v2678_v8 }
 0x9cd   :  { %v2652_v14 = vpop.xlane.xlu0 %2651 }
 0x9ce   :  { %v2670_v12 = vsub.f32 %v2637_v51, %v2652_v14 }
 0x9d0   :  { %v2680_v20 = vmul.f32 1.442695, %v2670_v12 }
 0x9d1   :  { %v2655_v21 = vpop.xlane.xlu0 %2654 }
 0x9d2   :  { %4358 = vpow2.f32 %v2680_v20  ;;  %v2671_v6 = vsub.f32 %v2638_v53, %v2655_v21 }
 0x9d4   :  { %v2682_v27 = vmul.f32 1.442695, %v2671_v6 }
 0x9d5   :  { %v2658_v28 = vpop.xlane.xlu1 %2657  ;;  %v2661_v29 = vpop.xlane.xlu0 %2660 }
 0x9d6   :  { %4360 = vpow2.f32 %v2682_v27  ;;  %v2672_v30 = vsub.f32 %v2639_v0, %v2658_v28  ;;  %v2673_v31 = vsub.f32 %v2640_v1, %v2661_v29 }
 0x9d7   :  { %v5236_v33 = vpop.eup %4356 }
 0x9d8   :  { %v2684_v34 = vmul.f32 1.442695, %v2672_v30  ;;  %v2686_v35 = vmul.f32 1.442695, %v2673_v31  ;;  %v2695_v36 = vsel %vm2643_vm9, %v5236_v33, 0.0 }
 0x9d9   :  { %2696 = vadd.xlane.f32.xlu0 %v2695_v36 }
 0x9da   :  { %4362 = vpow2.f32 %v2684_v34 }
 0x9db   :  { %4364 = vpow2.f32 %v2686_v35 }
 0x9dd   :  { %v2664_v37 = vpop.xlane.xlu1 %2663 }
 0x9de   :  { %v2674_v38 = vsub.f32 %v2641_v22, %v2664_v37  ;;  %v2667_v39 = vpop.xlane.xlu0 %2666 }
 0x9df   :  { %v5240_v40 = vpop.eup %4358  ;;  %v2675_v41 = vsub.f32 %v2642_v23, %v2667_v39  ;;  %v147_v39 = vld [vmem:[%s5440_s12 + $0x10] sm:$0xff] }
 0x9e0   :  { %v2688_v43 = vmul.f32 1.442695, %v2674_v38  ;;  %v2698_v45 = vsel %vm2643_vm9, %v5240_v40, 0.0 }
 0x9e1   :  { %v2690_v46 = vmul.f32 1.442695, %v2675_v41  ;;  %2699 = vadd.xlane.f32.xlu1 %v2698_v45  ;;  %v2816_v0 = vpop.permute.xlu1 %2815  ;;  %v146_v45 = vld [vmem:[%s5440_s12 + $0x8] sm:$0xff] }
 0x9e2   :  { %4366 = vpow2.f32 %v2688_v43  ;;  %v2733_v47 = vpop.permute.xlu0 %2732 }
 0x9e3   :  { %v5244_v49 = vpop.eup %4360  ;;  %4368 = vpow2.f32 %v2690_v46  ;;  %4203 = vmatpush3.msra.mxu0 %v2733_v47  ;;  %v145_v46 = vld [vmem:[%s5440_s12] sm:$0xff] }
 0x9e4   :  { %v2701_v51 = vsel %vm2643_vm9, %v5244_v49, 0.0  ;;  %4207 = vmatprep.subr.mxu0 %v4552_v7 }
 0x9e5   :  { %2702 = vadd.xlane.f32.xlu0 %v2701_v51  ;;  %v2814_v1 = vpop.permute.xlu1 %2813 }
 0x9e6   :  { %v2896_v52 = vpop.permute.xlu0 %2895 }
 0x9e7   :  { %v5249_v53 = vpop.eup %4362  ;;  %4215 = vmatpush3.msk.msra.mxu1 %vm2740_vm7, %v2896_v52 }
 0x9e8   :  { %v5252_v56 = vpop.eup %4364  ;;  %v2704_v17 = vsel %vm2643_vm9, %v5249_v53, 0.0  ;;  %4216 = vmatprep.subr.mxu1 %v4552_v7 }
 0x9e9   :  { %2705 = vadd.xlane.f32.xlu1 %v2704_v17  ;;  %v2707_v59 = vsel %vm2643_vm9, %v5252_v56, 0.0  ;;  %v2976_v3 = vpop.permute.xlu1 %2975 }
 0x9ea   :  { %2708 = vadd.xlane.f32.xlu0 %v2707_v59  ;;  %v2894_v60 = vpop.permute.xlu0 %2893 }
 0x9eb   :  { %4217 = vmatpush3.msra.mxu1 %v2894_v60 }
 0x9ec   :  { %4228 = vmatprep.subr.mxu1 %v4552_v7 }
 0x9ed   :  { %v2974_v4 = vpop.permute.xlu1 %2973 }
 0x9ef   :  { %v5260_v2 = vpop.eup %4366 }
 0x9f0   :  { %v5262_v61 = vpop.eup %4368  ;;  %v2710_v62 = vsel %vm2643_vm9, %v5260_v2, 0.0 }
 0x9f1   :  { %2711 = vadd.xlane.f32.xlu1 %v2710_v62  ;;  %v2713_v63 = vsel %vm2643_vm9, %v5262_v61, 0.0  ;;  %v3136_v9 = vpop.permute.xlu1 %3135 }
 0x9f2   :  { %2714 = vadd.xlane.f32.xlu0 %v2713_v63 }
 0x9f5   :  { %v3134_v10 = vpop.permute.xlu1 %3133 }
 0x9f9   :  { %v5272_v18 = vpop.permute.xlu1 %3295 }
 0xa02   :  { %3293 = vrot.lane.b32.xlu1 %v5170_v26, %s4557_s2 }
 0xa08   :  { %3213 = vrot.lane.b32.xlu0 %v5164_v24, %s4557_s2  ;;  %v3056_v24 = vpop.permute.xlu0 %3055 }
 0xa0c   :  { %v3054_v26 = vpop.permute.xlu0 %3053 }
 0xa10   :  { %v3216_v22 = vpop.permute.xlu0 %3215 }
 0xa2a   :  { %v2694_v19 = vpop.xlane.xlu1 %2693 }
 0xa2b   :  { %4370 = vrcp.f32 %v2694_v19 }
 0xa38   :  { %v4371_v13 = vpop.eup %4370 }
 0xa39   :  { %v2724_v15 = vmul.f32 %v4371_v13, %v5231_v57  ;;  %v3878_v13 = vld [vmem:[%s5441_s13] ss:$0 sm:$0xff] }
 0xa3b   :  { %4205 = vmatmul.mubr.msk.f32.vlgmr.msra.gmra.mxu0 %vm2643_vm9, %v2724_v15  ;;  %3741 = vst.msk [vmem:[#allocation13] sm:$0xff] %vm2643_vm9, %v2724_v15 }
 0xa3c   :  { %4208 = vmatpush3.msk.msra.mxu0 %vm2740_vm7, %v2816_v0  ;;  %4211 = vmatprep.mubr.msk.f32.mxu0 %vm4555_vm1, %v4552_v7 }
 0xa3d   :  { %4209 = vmatprep.subr.mxu0 %v4552_v7 }
 0xa3e   :  { %4210 = vmatpush3.msra.mxu0 %v2814_v1 }
 0xa3f   :  { %4221 = vmatprep.subr.mxu0 %v4552_v7 }
 0xa62   :  { %v2697_v11 = vpop.xlane.xlu0 %2696 }
 0xa63   :  { %4372 = vrcp.f32 %v2697_v11 }
 0xa6a   :  { %v2700_v23 = vpop.xlane.xlu1 %2699 }
 0xa6b   :  { %4374 = vrcp.f32 %v2700_v23 }
 0xa6e   :  { %v2703_v25 = vpop.xlane.xlu0 %2702 }
 0xa6f   :  { %4376 = vrcp.f32 %v2703_v25 }
 0xa70   :  { %v4373_v32 = vpop.eup %4372 }
 0xa71   :  { %v2725_v55 = vmul.f32 %v4373_v32, %v5236_v33 }
 0xa72   :  { %v2706_v16 = vpop.xlane.xlu1 %2705 }
 0xa73   :  { %4378 = vrcp.f32 %v2706_v16  ;;  %v2709_v57 = vpop.xlane.xlu0 %2708  ;;  %4212 = vmatmul.mubr.msk.f32.vlgmr.msra.gmra.mxu0 %vm2643_vm9, %v2725_v55  ;;  %3742 = vst.msk [vmem:[#allocation13 + $0x8] sm:$0xff] %vm2643_vm9, %v2725_v55 }
 0xa74   :  { %4380 = vrcp.f32 %v2709_v57  ;;  %4222 = vmatpush3.msk.msra.mxu0 %vm2740_vm7, %v2976_v3  ;;  %4225 = vmatprep.mubr.msk.f32.mxu0 %vm4555_vm1, %v4552_v7 }
 0xa75   :  { %4223 = vmatprep.subr.mxu0 %v4552_v7 }
 0xa76   :  { %4224 = vmatpush3.msra.mxu0 %v2974_v4 }
 0xa77   :  { %4235 = vmatprep.subr.mxu0 %v4552_v7 }
 0xa78   :  { %v4375_v54 = vpop.eup %4374 }
 0xa79   :  { %v2726_v58 = vmul.f32 %v4375_v54, %v5240_v40 }
 0xa7a   :  { %v2712_v5 = vpop.xlane.xlu1 %2711 }
 0xa7b   :  { %4382 = vrcp.f32 %v2712_v5  ;;  %4219 = vmatmul.mubr.msk.f32.vlgmr.msra.gmra.mxu1 %vm2643_vm9, %v2726_v58  ;;  %3743 = vst.msk [vmem:[#allocation13 + $0x10] sm:$0xff] %vm2643_vm9, %v2726_v58  ;;  %v2715_v8 = vpop.xlane.xlu0 %2714 }
 0xa7c   :  { %v4377_v14 = vpop.eup %4376  ;;  %4229 = vmatpush3.msk.msra.mxu1 %vm2740_vm7, %v3056_v24  ;;  %4384 = vrcp.f32 %v2715_v8  ;;  %4232 = vmatprep.mubr.msk.f32.mxu1 %vm4555_vm1, %v4552_v7 }
 0xa7d   :  { %4230 = vmatprep.subr.mxu1 %v4552_v7  ;;  %v2727_v12 = vmul.f32 %v4377_v14, %v5244_v49 }
 0xa7e   :  { %4231 = vmatpush3.msra.mxu1 %v3054_v26  ;;  %v3294_v29 = vpop.permute.xlu1 %3293 }
 0xa7f   :  { %4226 = vmatmul.mubr.msk.f32.vlgmr.msra.gmra.mxu0 %vm2643_vm9, %v2727_v12  ;;  %3744 = vst.msk [vmem:[#allocation13 + $0x18] sm:$0xff] %vm2643_vm9, %v2727_v12  ;;  %4242 = vmatprep.subr.mxu1 %v4552_v7  ;;  %v3214_v28 = vpop.permute.xlu0 %3213 }
 0xa80   :  { %v4379_v20 = vpop.eup %4378  ;;  %4236 = vmatpush3.msk.msra.mxu0 %vm2740_vm7, %v3136_v9  ;;  %4239 = vmatprep.mubr.msk.f32.mxu0 %vm4555_vm1, %v4552_v7 }
 0xa81   :  { %v4381_v21 = vpop.eup %4380  ;;  %4237 = vmatprep.subr.mxu0 %v4552_v7  ;;  %v2728_v6 = vmul.f32 %v4379_v20, %v5249_v53  ;;  %v152_v20 = vld [vmem:[#allocation8 + $0x10] sm:$0xff] }
 0xa82   :  { %4238 = vmatpush3.msra.mxu0 %v3134_v10  ;;  %v2729_v27 = vmul.f32 %v4381_v21, %v5252_v56  ;;  %v151_v21 = vld [vmem:[#allocation8 + $0x8] sm:$0xff] }
 0xa83   :  { %4233 = vmatmul.mubr.msk.f32.vlgmr.msra.gmra.mxu1 %vm2643_vm9, %v2728_v6  ;;  %3745 = vst.msk [vmem:[#allocation13 + $0x20] sm:$0xff] %vm2643_vm9, %v2728_v6  ;;  %4249 = vmatprep.subr.mxu0 %v4552_v7  ;;  %v150_v6 = vld [vmem:[#allocation8] sm:$0xff] }
 0xa84   :  { %4243 = vmatpush3.msk.msra.mxu1 %vm2740_vm7, %v3216_v22  ;;  %4240 = vmatmul.mubr.msk.f32.vlgmr.msra.gmra.mxu0 %vm2643_vm9, %v2729_v27  ;;  %3746 = vst.msk [vmem:[#allocation13 + $0x28] sm:$0xff] %vm2643_vm9, %v2729_v27  ;;  %v162_v27 = vld [vmem:[%s5444_s16 + $0x38] sm:$0xff] }
 0xa85   :  { %4244 = vmatprep.subr.mxu1 %v4552_v7  ;;  %4250 = vmatpush3.msk.msra.mxu0 %vm2740_vm7, %v5272_v18 }
 0xa86   :  { %4245 = vmatpush3.msra.mxu1 %v3214_v28  ;;  %4251 = vmatprep.subr.mxu0 %v4552_v7  ;;  %v161_v28 = vld [vmem:[%s5444_s16 + $0x30] sm:$0xff] }
 0xa87   :  { %4252 = vmatpush3.msra.mxu0 %v3294_v29  ;;  %4246 = vmatprep.mubr.msk.f32.mxu1 %vm4555_vm1, %v4552_v7  ;;  %v160_v29 = vld [vmem:[%s5444_s16 + $0x28] sm:$0xff] }
 0xa88   :  { %v4383_v30 = vpop.eup %4382  ;;  %4253 = vmatprep.mubr.msk.f32.mxu0 %vm4555_vm1, %v4552_v7  ;;  %v148_v7 = vld [vmem:[%s5440_s12 + $0x18] sm:$0xff] }
 0xa89   :  { %v4385_v31 = vpop.eup %4384  ;;  %v2730_v33 = vmul.f32 %v4383_v30, %v5260_v2  ;;  %4256 = vmatprep.subr.mxu1 %v148_v7  ;;  %v159_v30 = vld [vmem:[%s5444_s16 + $0x20] sm:$0xff] }
 0xa8a   :  { %v2731_v34 = vmul.f32 %v4385_v31, %v5262_v61 }
 0xa8b   :  { %4247 = vmatmul.mubr.msk.f32.vlgmr.msra.gmra.mxu1 %vm2643_vm9, %v2730_v33  ;;  %3747 = vst.msk [vmem:[#allocation13 + $0x30] sm:$0xff] %vm2643_vm9, %v2730_v33 }
 0xa8c   :  { %4254 = vmatmul.mubr.msk.f32.vlgmr.msra.gmra.mxu0 %vm2643_vm9, %v2731_v34  ;;  %3748 = vst.msk [vmem:[#allocation13 + $0x38] sm:$0xff] %vm2643_vm9, %v2731_v34  ;;  %4257 = vmatpush3.msra.mxu1 %v148_v7 }
 0xa8d   :  { %4258 = vmatprep.subr.mxu1 %v147_v39 }
 0xa8e   :  { %4259 = vmatpush3.msra.mxu1 %v147_v39 }
 0xa8f   :  { %4260 = vmatprep.subr.mxu1 %v146_v45 }
 0xa90   :  { %4261 = vmatpush3.msra.mxu1 %v146_v45 }
 0xa91   :  { %4262 = vmatprep.subr.mxu1 %v145_v46 }
 0xa92   :  { %4263 = vmatpush3.msra.mxu1 %v145_v46 }
 0xa93   :  { %4278 = vmatprep.subr.mxu1 %v162_v27 }
 0xafb   :  { %v2809_v35 = vpop.f32.mrf.mxu0 }
 0xafd   :  { %v4206_v36 = vpop.f32.mrf.mxu0 }
 0xb33   :  { %v2889_v37 = vpop.f32.mrf.mxu0 }
 0xb34   :  { %3375 = vrot.lane.b32.xlu0 %v2889_v37, %s4549_s23 }
 0xb35   :  { %v4213_v38 = vpop.f32.mrf.mxu0 }
 0xb3b   :  { %v2969_v40 = vpop.f32.mrf.mxu1 }
 0xb3c   :  { %3383 = vrot.lane.b32.xlu0 %v2969_v40, %s4559_s1 }
 0xb3d   :  { %v4220_v41 = vpop.f32.mrf.mxu1 }
 0xb3f   :  { %v3049_v43 = vpop.f32.mrf.mxu0 }
 0xb40   :  { %3391 = vrot.lane.b32.xlu0 %v3049_v43, %s4560_s3 }
 0xb41   :  { %v4227_v47 = vpop.f32.mrf.mxu0 }
 0xb42   :  { %v158_v47 = vld [vmem:[%s5444_s16 + $0x18] sm:$0xff] }
 0xb43   :  { %v3129_v49 = vpop.f32.mrf.mxu1 }
 0xb44   :  { %v3209_v51 = vpop.f32.mrf.mxu0 }
 0xb45   :  { %v4234_v52 = vpop.f32.mrf.mxu1  ;;  %3377 = vrot.lane.b32.xlu1 %v3209_v51, %s4549_s23  ;;  %v3881_v51 = vld [vmem:[%s5443_s15] ss:$0 sm:$0xff]  ;;  %s4561_s15 = smov [#allocation11]  }
 0xb46   :  { %v4241_v53 = vpop.f32.mrf.mxu0 }
 0xb4b   :  { %v3289_v56 = vpop.f32.mrf.mxu1 }
 0xb4c   :  { %v3369_v17 = vpop.f32.mrf.mxu0  ;;  %3385 = vrot.lane.b32.xlu1 %v3289_v56, %s4559_s1 }
 0xb4d   :  { %v4248_v59 = vpop.f32.mrf.mxu1 }
 0xb4e   :  { %v4255_v60 = vpop.f32.mrf.mxu0 }
 0xb50   :  { %3393 = vrot.lane.b32.xlu1 %v3369_v17, %s4560_s3 }
 0xba6   :  { %v3376_v2 = vpop.permute.xlu0 %3375 }
 0xba7   :  { %v3397_v62 = vsel %vm286_vm2, %v2809_v35, %v3376_v2  ;;  %v3884_v2 = vld [vmem:[%s5445_s17] ss:$0 sm:$0xff] }
 0xbae   :  { %v3384_v61 = vpop.permute.xlu0 %3383 }
 0xbaf   :  { %v3399_v63 = vsel %vm1633_vm5, %v3397_v62, %v3384_v61 }
 0xbb2   :  { %v3392_v0 = vpop.permute.xlu0 %3391 }
 0xbb3   :  { %v3401_v1 = vsel %vm1636_vm6, %v3399_v63, %v3392_v0 }
 0xbb4   :  { %4264 = vmatprep.mubr.msk.f32.mxu1 %vm188_vm0, %v3401_v1 }
 0xbb7   :  { %v3378_v3 = vpop.permute.xlu1 %3377 }
 0xbb8   :  { %v3398_v9 = vsel %vm286_vm2, %v3129_v49, %v3378_v3  ;;  %v157_v49 = vld [vmem:[%s5444_s16 + $0x10] sm:$0xff] }
 0xbbe   :  { %v3386_v4 = vpop.permute.xlu1 %3385 }
 0xbbf   :  { %v3400_v10 = vsel %vm1633_vm5, %v3398_v9, %v3386_v4 }
 0xbc2   :  { %v3394_v18 = vpop.permute.xlu1 %3393 }
 0xbc3   :  { %v3402_v19 = vsel %vm1636_vm6, %v3400_v10, %v3394_v18 }
 0xbc4   :  { %4265 = vmatmul.mubr.msk.f32.vlgmr.msra.gmra.mxu1 %vm188_vm0, %v3402_v19 }
 0xbc5   :  { %4279 = vmatpush3.msra.mxu1 %v162_v27 }
 0xbc6   :  { %4280 = vmatprep.subr.mxu1 %v161_v28 }
 0xbc7   :  { %4281 = vmatpush3.msra.mxu1 %v161_v28 }
 0xbc8   :  { %4282 = vmatprep.subr.mxu1 %v160_v29 }
 0xbc9   :  { %4283 = vmatpush3.msra.mxu1 %v160_v29 }
 0xbca   :  { %4284 = vmatprep.subr.mxu1 %v159_v30 }
 0xbcb   :  { %4285 = vmatpush3.msra.mxu1 %v159_v30 }
 0xbcc   :  { %4286 = vmatprep.subr.mxu1 %v158_v47 }
 0xbcd   :  { %4287 = vmatpush3.msra.mxu1 %v158_v47 }
 0xbce   :  { %4288 = vmatprep.subr.mxu1 %v157_v49 }
 0xbcf   :  { %4289 = vmatpush3.msra.mxu1 %v157_v49 }
 0xc84   :  { %v4266_v15 = vpop.f32.mrf.mxu1 }
 0xc85   :  { %v3487_v24 = vadd.f32 %v4266_v15, %v3878_v13 }
 0xc86   :  { %v3481_v26 = vpop.f32.mrf.mxu1 }
 0xc87   :  { %v3491_v22 = vadd.f32 %v3487_v24, %v5045_v50  ;;  %v3482_v11 = vadd.f32 %v3878_v13, %v3481_v26 }
 0xc89   :  { %v3490_v23 = vadd.f32 %v3482_v11, %v5039_v48  ;;  %v3495_v25 = vsel %vm188_vm0, %v3491_v22, 0.0  ;;  %v153_v48 = vld [vmem:[#allocation8 + $0x18] sm:$0xff] }
 0xc8a   :  { %3496 = vadd.xlane.f32.xlu1 %v3495_v25  ;;  %4267 = vmatprep.subr.mxu0 %v153_v48 }
 0xc8b   :  { %v3492_v32 = vsel %vm188_vm0, %v3490_v23, 0.0  ;;  %4268 = vmatpush3.msra.mxu0 %v153_v48 }
 0xc8c   :  { %3493 = vadd.xlane.f32.xlu0 %v3492_v32  ;;  %4269 = vmatprep.subr.mxu0 %v152_v20 }
 0xc8d   :  { %4270 = vmatpush3.msra.mxu0 %v152_v20 }
 0xc8e   :  { %4271 = vmatprep.subr.mxu0 %v151_v21 }
 0xc8f   :  { %4272 = vmatpush3.msra.mxu0 %v151_v21 }
 0xc90   :  { %4273 = vmatprep.subr.mxu0 %v150_v6 }
 0xc91   :  { %4274 = vmatpush3.msra.mxu0 %v150_v6 }
 0xd13   :  { %v3497_v55 = vpop.xlane.xlu1 %3496 }
 0xd14   :  { %v3499_v16 = vmul.f32 0.03125, %v3497_v55 }
 0xd15   :  { %v3494_v57 = vpop.xlane.xlu0 %3493 }
 0xd16   :  { %v3498_v54 = vmul.f32 0.03125, %v3494_v57  ;;  %v3501_v58 = vsub.f32 %v3491_v22, %v3499_v16 }
 0xd18   :  { %v3500_v5 = vsub.f32 %v3490_v23, %v3498_v54  ;;  %v3503_v12 = vmul.f32 %v3501_v58, %v3501_v58 }
 0xd1a   :  { %v3502_v8 = vmul.f32 %v3500_v5, %v3500_v5  ;;  %v3507_v50 = vsel %vm188_vm0, %v3503_v12, 0.0 }
 0xd1c   :  { %v3504_v14 = vsel %vm188_vm0, %v3502_v8, 0.0 }
 0xd1d   :  { %3505 = vadd.xlane.f32.xlu0 %v3504_v14 }
 0xd21   :  { %3508 = vadd.xlane.f32.xlu0 %v3507_v50 }
 0xda6   :  { %v3506_v31 = vpop.xlane.xlu0 %3505 }
 0xda7   :  { %v3510_v33 = vmul.f32 0.03125, %v3506_v31 }
 0xda9   :  { %v3512_v34 = vadd.f32 1e-05, %v3510_v33 }
 0xdaa   :  { %v3509_v35 = vpop.xlane.xlu0 %3508 }
 0xdab   :  { %4386 = vrsqrt.f32 %v3512_v34  ;;  %v3511_v36 = vmul.f32 0.03125, %v3509_v35 }
 0xdad   :  { %v3513_v37 = vadd.f32 1e-05, %v3511_v36 }
 0xdaf   :  { %4388 = vrsqrt.f32 %v3513_v37 }
 0xdb8   :  { %v4387_v38 = vpop.eup %4386 }
 0xdb9   :  { %v3516_v7 = vmul.f32 %v4387_v38, %v3500_v5 }
 0xdbb   :  { %v3518_v39 = vmul.f32 %v5030_v42, %v3516_v7 }
 0xdbc   :  { %v4389_v40 = vpop.eup %4388 }
 0xdbd   :  { %v3517_v41 = vmul.f32 %v4389_v40, %v3501_v58  ;;  %v3520_v43 = vadd.f32 %v5035_v44, %v3518_v39 }
 0xdbf   :  { %4275 = vmatprep.mubr.msk.f32.mxu0 %vm188_vm0, %v3520_v43  ;;  %v3519_v45 = vmul.f32 %v5030_v42, %v3517_v41  ;;  %v156_v42 = vld [vmem:[%s5444_s16 + $0x8] sm:$0xff] }
 0xdc0   :  { %4290 = vmatprep.subr.mxu1 %v156_v42 }
 0xdc1   :  { %v3521_v46 = vadd.f32 %v5035_v44, %v3519_v45  ;;  %v155_v44 = vld [vmem:[%s5444_s16] sm:$0xff]  ;;  %4291 = vmatpush3.msra.mxu1 %v156_v42  ;;  %s3766_s16 = sshll.u32 %s4561_s15, 4  ;;  %s3767_s16 = int_to_ptr.vmem [resolvable:$true] %s3766_s16 }
 0xdc2   :  { %4292 = vmatprep.subr.mxu1 %v155_v44  ;;  %s4476_s17 = scalar_lea.vmem %s3767_s16, 1024  ;;  %p4481_p7 = scmp.lt.s32.totalorder %s3767_s16, %s3767_s16 }
 0xdc3   :  { %4276 = vmatmul.mubr.msk.f32.vlgmr.msra.gmra.mxu0 %vm188_vm0, %v3521_v46  ;;  %4293 = vmatpush3.msra.mxu1 %v155_v44  ;;  %p4477_p6 = scmp.ne.s32.totalorder %s3767_s16, %s4476_s17  ;;  %p4482_p8 = scmp.lt.s32.totalorder %s4476_s17, %s4476_s17 }
 0xdc5   :  { %p4483_p9 = por %p4482_p8, %p4481_p7 }
 0xdc7   :  { %p4484_p10 = pnand %p4483_p9, %p4477_p6 }
 0xe83   :  { %v4277_v52 = vpop.f32.mrf.mxu0 }
 0xe84   :  { %v3606_v53 = vadd.f32 %v4277_v52, %v3881_v51 }
 0xe85   :  { %v3600_v56 = vpop.f32.mrf.mxu0 }
 0xe86   :  { %v3601_v17 = vadd.f32 %v3881_v51, %v3600_v56  ;;  %v3610_v60 = vmax.f32 %v3606_v53, 0.0 }
 0xe88   :  { %v3609_v59 = vmax.f32 %v3601_v17, 0.0 }
 0xe8a   :  { %4294 = vmatprep.mubr.msk.f32.mxu1 %vm3617_vm11, %v3609_v59 }
 0xe8b   :  { %4295 = vmatmul.mubr.msk.f32.vlgmr.msra.gmra.mxu1 %vm3617_vm11, %v3610_v60 }
 0xf4b   :  { %v4296_v61 = vpop.f32.mrf.mxu1 }
 0xf4c   :  { %v3696_v62 = vadd.f32 %v4296_v61, %v3884_v2 }
 0xf4d   :  { %v3690_v63 = vpop.f32.mrf.mxu1 }
 0xf4e   :  { %v3700_v0 = vadd.f32 %v3696_v62, %v3521_v46  ;;  %v3691_v1 = vadd.f32 %v3884_v2, %v3690_v63 }
 0xf50   :  { %v3699_v3 = vadd.f32 %v3691_v1, %v3520_v43  ;;  %v3704_v4 = vsel %vm188_vm0, %v3700_v0, 0.0 }
 0xf51   :  { %3705 = vadd.xlane.f32.xlu0 %v3704_v4 }
 0xf52   :  { %v3701_v9 = vsel %vm188_vm0, %v3699_v3, 0.0 }
 0xf53   :  { %3702 = vadd.xlane.f32.xlu1 %v3701_v9 }
 0xfda   :  { %v3706_v10 = vpop.xlane.xlu0 %3705 }
 0xfdb   :  { %v3708_v18 = vmul.f32 0.03125, %v3706_v10 }
 0xfdc   :  { %v3703_v19 = vpop.xlane.xlu1 %3702 }
 0xfdd   :  { %v3710_v13 = vsub.f32 %v3700_v0, %v3708_v18  ;;  %v3707_v15 = vmul.f32 0.03125, %v3703_v19 }
 0xfdf   :  { %v3709_v24 = vsub.f32 %v3699_v3, %v3707_v15  ;;  %v3712_v26 = vmul.f32 %v3710_v13, %v3710_v13 }
 0xfe1   :  { %v3716_v22 = vsel %vm188_vm0, %v3712_v26, 0.0  ;;  %v3711_v11 = vmul.f32 %v3709_v24, %v3709_v24 }
 0xfe2   :  { %3717 = vadd.xlane.f32.xlu0 %v3716_v22 }
 0xfe3   :  { %v3713_v23 = vsel %vm188_vm0, %v3711_v11, 0.0 }
 0xfe4   :  { %3714 = vadd.xlane.f32.xlu1 %v3713_v23 }
 0xfe5   :  { %4487 = shalt.err (!%p4484_p10)
}
 0xfe6   :  { %3772 = dma.vmem_to_hbm [thread:$0]  %s3767_s16, 1024, %s5449_s21, [#allocation12], %s4548_s0, %s4548_s0, %s4549_s23  }
 0xfe7   :  { %s4562_s3 = smov [#allocation13]  }
 0xfe8   :  { %s3778_s30 = sshll.u32 %s4562_s3, 4  ;;  %s3779_s30 = int_to_ptr.vmem [resolvable:$true] %s3778_s30 }
 0xfe9   :  { %s4496_s10 = scalar_lea.vmem %s3779_s30, 1024  ;;  %p4501_p12 = scmp.lt.s32.totalorder %s3779_s30, %s3779_s30 }
 0xfea   :  { %p4497_p11 = scmp.ne.s32.totalorder %s3779_s30, %s4496_s10  ;;  %p4502_p13 = scmp.lt.s32.totalorder %s4496_s10, %s4496_s10 }
 0xfec   :  { %p4503_p0 = por %p4502_p13, %p4501_p12 }
 0xfee   :  { %p4504_p1 = pnand %p4503_p0, %p4497_p11 }
 0xff0   :  { %4507 = shalt.err (!%p4504_p1)
}
 0xff1   :  { %3784 = dma.vmem_to_hbm [thread:$0]  %s3779_s30, 1024, %s5450_s22, [#allocation12], %s4548_s0, %s4548_s0, %s4549_s23  }
 0xff2   :  { %v4394_v12 = vld [vmem:[%s5446_s18] ss:$0 sm:$0xff]  ;;  %s4563_s14 = smov [#allocation10]  }
 0xff3   :  { %s3754_s4 = sshll.u32 %s4563_s14, 4  ;;  %v4395_v20 = vld [vmem:[%s5447_s19] ss:$0 sm:$0xff]  ;;  %s3755_s4 = int_to_ptr.vmem [resolvable:$true] %s3754_s4 }
 0xff4   :  { %s4516_s5 = scalar_lea.vmem %s3755_s4, 256  ;;  %p4521_p3 = scmp.lt.s32.totalorder %s3755_s4, %s3755_s4 }
 0xff5   :  { %p4517_p2 = scmp.ne.s32.totalorder %s3755_s4, %s4516_s5  ;;  %p4522_p4 = scmp.lt.s32.totalorder %s4516_s5, %s4516_s5 }
 0xff7   :  { %p4523_p5 = por %p4522_p4, %p4521_p3 }
 0xff9   :  { %p4524_p6 = pnand %p4523_p5, %p4517_p2 }
0x106b   :  { %v3718_v25 = vpop.xlane.xlu0 %3717 }
0x106c   :  { %v3720_v32 = vmul.f32 0.03125, %v3718_v25 }
0x106d   :  { %v3715_v55 = vpop.xlane.xlu1 %3714 }
0x106e   :  { %v3722_v16 = vadd.f32 1e-05, %v3720_v32  ;;  %v3719_v57 = vmul.f32 0.03125, %v3715_v55 }
0x1070   :  { %4390 = vrsqrt.f32 %v3722_v16  ;;  %v3721_v54 = vadd.f32 1e-05, %v3719_v57 }
0x1072   :  { %4392 = vrsqrt.f32 %v3721_v54 }
0x107d   :  { %v4391_v58 = vpop.eup %4390 }
0x107e   :  { %v3726_v5 = vmul.f32 %v4391_v58, %v3710_v13 }
0x107f   :  { %v4393_v8 = vpop.eup %4392 }
0x1080   :  { %v3725_v14 = vmul.f32 %v4393_v8, %v3709_v24  ;;  %v3728_v50 = vmul.f32 %v4394_v12, %v3726_v5 }
0x1082   :  { %v3727_v48 = vmul.f32 %v4394_v12, %v3725_v14  ;;  %v3730_v21 = vadd.f32 %v4395_v20, %v3728_v50 }
0x1084   :  { %v3729_v6 = vadd.f32 %v4395_v20, %v3727_v48  ;;  %3732 = vst.msk [vmem:[#allocation10 + $0x8] sm:$0xff] %vm188_vm0, %v3730_v21 }
0x1086   :  { %3731 = vst.msk [vmem:[#allocation10] sm:$0xff] %vm188_vm0, %v3729_v6 }
0x1087   :  { %4527 = shalt.err (!%p4524_p6)
}
0x1088   :  { %3760 = dma.vmem_to_hbm [thread:$0]  %s3755_s4, 256, %s5448_s20, [#allocation4], %s4548_s0, %s4548_s0, %s4549_s23  }
0x1089   :  { %4542 = dma.done.wait [#allocation4], 256  }
0x108a   :  { %4543 = vsyncadd [#allocation4], 4294967040 }
0x108b   :  { %4544 = dma.done.wait [#allocation12], 2048  }
0x108c   :  { %4545 = vsyncadd [#allocation12], 4294965248 }
0x108d   :  { %3794 = vsyncpa [#allocation3], 1 }
0x108e   :  { %3795 = vsyncpa [#allocation6], 1 }
0x108f   :  { %3796 = vsyncpa [#allocation9], 1 }
0x1090   :  { %3797 = vsyncpa [#allocation4], 1 }
0x1091   :  { %3798 = vsyncpa [#allocation12], 1 }

</bundles_post_ra>
